<compile_context>
chip_gen: v7x
topology: tpu7x:2x2x1
jax: 0.10.0
libtpu: 0.0.40
codegen_flags: <defaults>
</compile_context>

<pallas_src>
import math

import jax
import jax.numpy as jnp
from jax.experimental import pallas as pl
from jax.experimental.pallas import tpu as pltpu

SQRT2_INV = 1.0 / math.sqrt(2.0)
BN_EPS = 1e-5
LANE = 128
NC_TILE = 1024                     # final-layer cell tile width (lane-dense)
VMEM_LIMIT = 32 * 1024 * 1024      # keep <= 32 MiB scoped so the plan fits v7x


# ----------------------------- helpers from the module -----------------------------
def _col_round(x):
    frac = x - math.floor(x)
    if frac <= 0.5:
        return math.floor(x)
    return math.ceil(x)


def _get_filter_dim(seq_length, pooling_sizes):
    filter_dim = seq_length
    for ps in pooling_sizes:
        filter_dim = _col_round(filter_dim / ps)
    return filter_dim


def _round(x):
    return int(round(x))


def _pad_to(n, m=LANE):
    return ((n + m - 1) // m) * m


# ----------------------------- conv block kernel -----------------------------
def _make_conv_kernel(L, K, ps, T, c_in_s, c_out_p, pad_l, pad_r):
    """Fused Conv1d('same') + folded(bias+BN) + exact GELU + MaxPool1d (floor)."""

    def kernel(x_ref, w_ref, scale_ref, shift_ref, out_ref, *scratch):
        if K > 1:
            # 'same' halo staged once into a bf16 VMEM scratch (no padded HBM copy,
            # no f32 round-trip).
            xpad = scratch[0]  # (L + K - 1, c_in_s) bf16
            if pad_l:
                xpad[0:pad_l, :] = jnp.zeros((pad_l, c_in_s), jnp.bfloat16)
            if pad_r:
                xpad[pad_l + L:pad_l + L + pad_r, :] = jnp.zeros(
                    (pad_r, c_in_s), jnp.bfloat16)
            xpad[pad_l:pad_l + L, :] = x_ref[0]

            # Paired-tap accumulation: each dot has a 256-deep contraction (fills
            # the v6e/v7x MXU); the full (L, K*Cin_pad) im2col is never materialized
            # so nothing spills out of the vreg file.
            acc = jnp.zeros((L, c_out_p), jnp.float32)
            k = 0
            while k < K:
                if k + 1 < K:
                    lhs = jnp.concatenate(
                        [xpad[k:k + L, :], xpad[k + 1:k + 1 + L, :]], axis=-1)
                    rhs = w_ref[k * c_in_s:(k + 2) * c_in_s, :]
                    step = 2
                else:
                    lhs = xpad[k:k + L, :]
                    rhs = w_ref[k * c_in_s:(k + 1) * c_in_s, :]
                    step = 1
                acc = acc + jnp.dot(lhs, rhs, preferred_element_type=jnp.float32)
                k += step
        else:
            # 1x1 conv (pre-bottleneck layer, and the repacked stem layer).
            acc = jnp.dot(x_ref[0], w_ref[...], preferred_element_type=jnp.float32)

        # conv bias + BatchNorm1d(eval) folded into per-channel scale/shift
        acc = acc * scale_ref[...] + shift_ref[...]
        # exact (erf-based) GELU -- matches torch.nn.GELU() default
        acc = 0.5 * acc * (1.0 + jax.lax.erf(acc * SQRT2_INV))
        if ps > 1:
            # MaxPool1d(pool_size): floor semantics (ceil_mode=False)
            acc = jnp.max(acc[:T * ps, :].reshape(T, ps, c_out_p), axis=1)
        out_ref[0] = acc.astype(out_ref.dtype)

    return kernel


def conv_block(x, w, scale, shift, *, K, ps):
    """x: (B, L, Cin_pad) bf16 channels-last.  w: (K*Cin_pad, Cout_pad) bf16."""
    B, L, c_in_s = x.shape
    c_out_p = w.shape[-1]
    T = L // ps
    pad_l = (K - 1) // 2
    pad_r = K - 1 - pad_l
    kern = _make_conv_kernel(L, K, ps, T, c_in_s, c_out_p, pad_l, pad_r)
    scratch = [pltpu.VMEM((L + K - 1, c_in_s), jnp.bfloat16)] if K > 1 else []
    return pl.pallas_call(
        kern,
        out_shape=jax.ShapeDtypeStruct((B, T, c_out_p), jnp.bfloat16),
        grid=(B,),
        in_specs=[
            pl.BlockSpec((1, L, c_in_s), lambda b: (b, 0, 0)),
            pl.BlockSpec(w.shape, lambda b: (0, 0)),
            pl.BlockSpec((1, c_out_p), lambda b: (0, 0)),
            pl.BlockSpec((1, c_out_p), lambda b: (0, 0)),
        ],
        out_specs=pl.BlockSpec((1, T, c_out_p), lambda b: (b, 0, 0)),
        scratch_shapes=scratch,
        compiler_params=pltpu.CompilerParams(
            dimension_semantics=("parallel",),
            vmem_limit_bytes=VMEM_LIMIT),
    )(x, w, scale, shift)


# ----------------------------- dense head kernels -----------------------------
def _bottleneck_kernel(x_ref, w1_ref, sc_ref, sh_ref, h_ref, acc_ref):
    # Linear bias + BatchNorm1d(eval) folded into scale/shift; activation = Identity.
    # Contraction (Fp) is tiled over the grid: accumulate into an f32 scratch.
    @pl.when(pl.program_id(0) == 0)
    def _():
        acc_ref[...] = jnp.zeros_like(acc_ref)

    acc_ref[...] += jnp.dot(x_ref[...], w1_ref[...],
                            preferred_element_type=jnp.float32)

    @pl.when(pl.program_id(0) == pl.num_programs(0) - 1)
    def _():
        h_ref[...] = (acc_ref[...] * sc_ref[...] + sh_ref[...]).astype(h_ref.dtype)


def bottleneck(x_flat, w1, sc1, sh1):
    B, Fp = x_flat.shape
    nb_p = w1.shape[-1]
    # Largest 128-multiple tile (<= 4096) that divides Fp: pipelines the w1 DMA
    # against the MXU and bounds VMEM on v7x.
    fk = Fp
    for cand in (4096, 2048, 1024, 512, 256, 128):
        if Fp % cand == 0:
            fk = cand
            break
    return pl.pallas_call(
        _bottleneck_kernel,
        out_shape=jax.ShapeDtypeStruct((B, nb_p), jnp.bfloat16),
        grid=(Fp // fk,),
        in_specs=[
            pl.BlockSpec((B, fk), lambda k: (0, k)),
            pl.BlockSpec((fk, nb_p), lambda k: (k, 0)),
            pl.BlockSpec((1, nb_p), lambda k: (0, 0)),
            pl.BlockSpec((1, nb_p), lambda k: (0, 0)),
        ],
        out_specs=pl.BlockSpec((B, nb_p), lambda k: (0, 0)),
        scratch_shapes=[pltpu.VMEM((B, nb_p), jnp.float32)],
        compiler_params=pltpu.CompilerParams(
            dimension_semantics=("arbitrary",),
            vmem_limit_bytes=VMEM_LIMIT),
    )(x_flat, w1, sc1, sh1)


def _final_kernel(h_ref, w2_ref, b2_ref, out_ref):
    logits = jnp.dot(h_ref[...], w2_ref[...], preferred_element_type=jnp.float32)
    out_ref[...] = jax.nn.sigmoid(logits + b2_ref[...]).astype(out_ref.dtype)


def final_layer(h, w2, b2, *, tile_nc=NC_TILE):
    B, nb_p = h.shape
    nc_p = w2.shape[-1]
    assert nc_p % tile_nc == 0, "n_cells padding must be a multiple of tile_nc"
    return pl.pallas_call(
        _final_kernel,
        out_shape=jax.ShapeDtypeStruct((B, nc_p), jnp.float32),
        grid=(nc_p // tile_nc,),  # wide lane-dense cell tiles, parallel over cells
        in_specs=[
            pl.BlockSpec((B, nb_p), lambda j: (0, 0)),
            pl.BlockSpec((nb_p, tile_nc), lambda j: (0, j)),
            pl.BlockSpec((1, tile_nc), lambda j: (0, j)),
        ],
        out_specs=pl.BlockSpec((B, tile_nc), lambda j: (0, j)),
        compiler_params=pltpu.CompilerParams(
            dimension_semantics=("parallel",),
            vmem_limit_bytes=VMEM_LIMIT),
    )(h, w2, b2)


# ----------------------------- full forward -----------------------------
def scbasset_forward(x_ncl, kp):
    """x_ncl: (B, 4, L) PyTorch-style one-hot DNA; kp: prepare_kernel_params output."""
    x = jnp.transpose(x_ncl, (0, 2, 1))                      # NCL -> NLC (B, L, 4)
    layers = kp["conv_layers"]

    # Layer-0 repack: fold the 17-tap im2col into the channel dim so the stem
    # conv's contraction is K*4 (padded once to 128) instead of K*128.
    l0 = layers[0]
    K0 = l0["im2col_K"]
    pad_l0 = (K0 - 1) // 2
    B, L, cin = x.shape
    xp = jnp.pad(x, ((0, 0), (pad_l0, K0 - 1 - pad_l0), (0, 0)))
    x = jnp.concatenate([xp[:, k:k + L, :] for k in range(K0)], axis=-1)  # (B,L,K0*4)
    x = jnp.pad(x, ((0, 0), (0, 0), (0, l0["c_in_s"] - K0 * cin)))
    x = x.astype(jnp.bfloat16)

    for layer in layers:
        x = conv_block(x, layer["w"], layer["scale"], layer["shift"],
                       K=layer["K"], ps=layer["ps"])
    B = x.shape[0]
    x_flat = x.reshape(B, -1)   # channels-last flatten; w1 rows pre-permuted to match
    h = bottleneck(x_flat, kp["w1"], kp["sc1"], kp["sh1"])
    out = final_layer(h, kp["w2"], kp["b2"])
    return out[:, :kp["n_cells"]]


# ----------------------------- pure-JAX reference -----------------------------
def scbasset_reference(x_ncl, params):
    x = jnp.transpose(x_ncl, (0, 2, 1)).astype(jnp.bfloat16)
    for layer in params["conv_layers"]:
        K, ps = layer["K"], layer["ps"]
        w = layer["w"].astype(jnp.bfloat16)                  # (K, Cin, Cout)
        B, L, _ = x.shape
        c_out = w.shape[-1]
        pad_l = (K - 1) // 2
        xpad = jnp.pad(x, ((0, 0), (pad_l, K - 1 - pad_l), (0, 0)))
        acc = jnp.zeros((B, L, c_out), jnp.float32)
        for k in range(K):
            acc = acc + jnp.einsum("blc,co->blo", xpad[:, k:k + L, :], w[k],
                                   preferred_element_type=jnp.float32)
        acc = acc * layer["scale"][None] + layer["shift"][None]
        acc = 0.5 * acc * (1.0 + jax.lax.erf(acc * SQRT2_INV))
        T = L // ps
        if ps > 1:
            acc = jnp.max(acc[:, :T * ps].reshape(B, T, ps, c_out), axis=2)
        x = acc.astype(jnp.bfloat16)
    B = x.shape[0]
    xf = jnp.transpose(x, (0, 2, 1)).reshape(B, -1)          # torch x.view(B,-1) on (B,C,T)
    h = jnp.dot(xf, params["w1"].astype(jnp.bfloat16),
                preferred_element_type=jnp.float32)
    h = (h * params["sc1"] + params["sh1"]).astype(jnp.bfloat16)
    logits = jnp.dot(h, params["w2"].astype(jnp.bfloat16),
                     preferred_element_type=jnp.float32) + params["b2"]
    return jax.nn.sigmoid(logits)


# ----------------------------- parameter init / prep -----------------------------
def _init_conv_layer(key, c_in, c_out, K, ps):
    k1, k2, k3, k4, k5, k6 = jax.random.split(key, 6)
    w = jax.random.normal(k1, (K, c_in, c_out), jnp.float32) / math.sqrt(c_in * K)
    b = 0.05 * jax.random.normal(k2, (c_out,), jnp.float32)
    gamma = 1.0 + 0.1 * jax.random.normal(k3, (c_out,), jnp.float32)
    beta = 0.1 * jax.random.normal(k4, (c_out,), jnp.float32)
    mean = 0.05 * jax.random.normal(k5, (c_out,), jnp.float32)
    var = jax.random.uniform(k6, (c_out,), jnp.float32, minval=0.5, maxval=1.5)
    scale = gamma / jnp.sqrt(var + BN_EPS)
    shift = (b - mean) * scale + beta
    return {"w": w, "scale": scale.reshape(1, c_out),
            "shift": shift.reshape(1, c_out), "K": K, "ps": ps}


def build_params(key, *, n_cells, n_filters_init, n_repeat_blocks_tower,
                 filters_mult, n_filters_pre_bottleneck, n_bottleneck_layer,
                 genomic_seq_length):
    cfgs = [(4, n_filters_init, 17, 3)]
    curr = n_filters_init
    for _ in range(n_repeat_blocks_tower):
        nxt = _round(curr * filters_mult)
        cfgs.append((curr, nxt, 5, 2))
        curr = nxt
    cfgs.append((curr, n_filters_pre_bottleneck, 1, 1))

    keys = jax.random.split(key, len(cfgs) + 8)
    conv_layers = [_init_conv_layer(keys[i], ci, co, K, ps)
                   for i, (ci, co, K, ps) in enumerate(cfgs)]

    # dense input size the way the PyTorch module computes it (col_round chain)
    filter_dim = _get_filter_dim(genomic_seq_length,
                                 [3] + [2] * n_repeat_blocks_tower + [1])
    # actual MaxPool1d output length uses floor; must agree, else the torch
    # model itself would shape-error at x.view(B, -1)
    t = genomic_seq_length
    for _, _, _, ps in cfgs:
        t //= ps
    assert t == filter_dim, "seq length incompatible with pooling chain"

    F = n_filters_pre_bottleneck * filter_dim
    nb, nc = n_bottleneck_layer, n_cells
    ks = keys[len(cfgs):]
    w1 = jax.random.normal(ks[0], (F, nb), jnp.float32) / math.sqrt(F)
    b1 = 0.05 * jax.random.normal(ks[1], (nb,), jnp.float32)
    gamma = 1.0 + 0.1 * jax.random.normal(ks[2], (nb,), jnp.float32)
    beta = 0.1 * jax.random.normal(ks[3], (nb,), jnp.float32)
    mean = 0.05 * jax.random.normal(ks[4], (nb,), jnp.float32)
    var = jax.random.uniform(ks[5], (nb,), jnp.float32, minval=0.5, maxval=1.5)
    sc1 = (gamma / jnp.sqrt(var + BN_EPS)).reshape(1, nb)
    sh1 = ((b1 - mean) * sc1[0] + beta).reshape(1, nb)
    w2 = jax.random.normal(ks[6], (nb, nc), jnp.float32) / math.sqrt(nb)
    b2 = (0.05 * jax.random.normal(ks[7], (nc,), jnp.float32)).reshape(1, nc)

    return {"conv_layers": conv_layers, "w1": w1, "sc1": sc1, "sh1": sh1,
            "w2": w2, "b2": b2, "n_cells": nc, "T_last": t}


def prepare_kernel_params(params):
    """Pad channel dims to 128 multiples, reshape conv weights for the tap-blocked
    matmuls (bf16), fold layer-0's im2col into its weight rows, and fold the
    flatten permutation into w1's rows."""
    conv_kp = []
    layers = params["conv_layers"]

    # --- layer 0: im2col is packed in the wrapper; weight becomes (pad(K*4), Cout_p)
    l0 = layers[0]
    K0, ps0 = l0["K"], l0["ps"]
    c_in0 = l0["w"].shape[1]
    c_out0 = l0["w"].shape[-1]
    c_in_s0 = _pad_to(K0 * c_in0)                     # 17*4 = 68 -> 128
    c_out_p0 = _pad_to(c_out0)
    w0 = jnp.zeros((c_in_s0, c_out_p0), jnp.float32)
    w0 = w0.at[:K0 * c_in0, :c_out0].set(l0["w"].reshape(K0 * c_in0, c_out0))
    conv_kp.append({
        "w": w0.astype(jnp.bfloat16),
        "scale": jnp.zeros((1, c_out_p0), jnp.float32).at[:, :c_out0].set(l0["scale"]),
        "shift": jnp.zeros((1, c_out_p0), jnp.float32).at[:, :c_out0].set(l0["shift"]),
        "K": 1, "ps": ps0, "c_in_s": c_in_s0, "im2col_K": K0,
    })
    c_in, c_in_s = c_out0, c_out_p0

    # --- remaining layers: (K * Cin_pad, Cout_pad) weights, per-tap row blocks ---
    for layer in layers[1:]:
        w = layer["w"]                                # (K, c_in, c_out)
        K, ps = layer["K"], layer["ps"]
        c_out = w.shape[-1]
        c_out_p = _pad_to(c_out)
        w_pad = jnp.zeros((K, c_in_s, c_out_p), jnp.float32)
        w_pad = w_pad.at[:, :c_in, :c_out].set(w)
        conv_kp.append({
            "w": w_pad.reshape(K * c_in_s, c_out_p).astype(jnp.bfloat16),
            "scale": jnp.zeros((1, c_out_p), jnp.float32).at[:, :c_out].set(layer["scale"]),
            "shift": jnp.zeros((1, c_out_p), jnp.float32).at[:, :c_out].set(layer["shift"]),
            "K": K, "ps": ps, "c_in_s": c_in_s,
        })
        c_in, c_in_s = c_out, c_out_p

    C_last, Cl_p, T_last = c_in, c_in_s, params["T_last"]
    nb = params["w1"].shape[-1]
    nc = params["w2"].shape[-1]
    nb_p = _pad_to(nb)
    nc_p = _pad_to(nc, NC_TILE)                       # final layer uses NC_TILE tiles
    # torch flatten of (B, C, T) is channel-major; kernels flatten (B, T, Cpad):
    # permute + pad w1's rows so no transpose is needed between conv and dense.
    w1 = params["w1"].reshape(C_last, T_last, nb).transpose(1, 0, 2)  # (T, C, nb)
    w1p = jnp.zeros((T_last, Cl_p, nb_p), jnp.float32).at[:, :C_last, :nb].set(w1)
    w1p = w1p.reshape(T_last * Cl_p, nb_p).astype(jnp.bfloat16)
    sc1 = jnp.zeros((1, nb_p), jnp.float32).at[:, :nb].set(params["sc1"])
    sh1 = jnp.zeros((1, nb_p), jnp.float32).at[:, :nb].set(params["sh1"])
    w2 = jnp.zeros((nb_p, nc_p), jnp.float32).at[:nb, :nc].set(params["w2"]).astype(jnp.bfloat16)
    b2 = jnp.zeros((1, nc_p), jnp.float32).at[:, :nc].set(params["b2"])
    return {"conv_layers": conv_kp, "w1": w1p, "sc1": sc1, "sh1": sh1,
            "w2": w2, "b2": b2, "n_cells": params["n_cells"]}


# ----------------------------- main -----------------------------
if __name__ == "__main__":
    key = jax.random.PRNGKey(0)
    k_x, k_p = jax.random.split(key)

    B = 4  # >= 2 parallel grid steps per TensorCore on v7x megacore
    cfg = dict(n_cells=8, n_filters_init=16, n_repeat_blocks_tower=2,
               filters_mult=1.122, n_filters_pre_bottleneck=16,
               n_bottleneck_layer=8, genomic_seq_length=96)

    params = build_params(k_p, **cfg)
    kparams = prepare_kernel_params(params)

    # PyTorch-style input: (batch, 4 nucleotide channels, sequence length)
    x = jax.random.normal(k_x, (B, 4, cfg["genomic_seq_length"]), jnp.float32)

    out = jax.block_until_ready(scbasset_forward(x, kparams))
    ref = scbasset_reference(x, params)

    assert out.shape == (B, cfg["n_cells"])
    assert bool(jnp.all(jnp.isfinite(out)))
    assert bool(jnp.allclose(out, ref, atol=2e-3, rtol=2e-3)), \
        f"max abs diff {float(jnp.max(jnp.abs(out - ref)))}"
    print("KERNEL_OK")
</pallas_src>

<mosaic_0001>
module attributes {stable_mosaic.version = 11 : i64} {
  func.func @kernel(%arg0: i32, %arg1: memref<1x96x128xbf16, #tpu.memory_space<vmem>>, %arg2: memref<128x128xbf16, #tpu.memory_space<vmem>>, %arg3: memref<1x128xf32, #tpu.memory_space<vmem>>, %arg4: memref<1x128xf32, #tpu.memory_space<vmem>>, %arg5: memref<1x32x128xbf16, #tpu.memory_space<vmem>>) attributes {dimension_semantics = [#tpu.dimension_semantics<parallel>], iteration_bounds = array<i64: 4>, scalar_prefetch = 0 : i64, scratch_operands = 0 : i64, tpu.core_type = #tpu.core_type<tc>, window_params = [{transform_indices = @transform_0, window_bounds = array<i64: 1, 96, 128>}, {pipeline_mode = #tpu.pipeline_mode<synchronous>, transform_indices = @transform_1, window_bounds = array<i64: 128, 128>}, {pipeline_mode = #tpu.pipeline_mode<synchronous>, transform_indices = @transform_2, window_bounds = array<i64: 1, 128>}, {pipeline_mode = #tpu.pipeline_mode<synchronous>, transform_indices = @transform_3, window_bounds = array<i64: 1, 128>}, {transform_indices = @transform_4, window_bounds = array<i64: 1, 32, 128>}]} {
    %c0 = arith.constant 0 : index
    %c0_0 = arith.constant 0 : index
    %c0_1 = arith.constant 0 : index
    %0 = vector.load %arg1[%c0, %c0_0, %c0_1] : memref<1x96x128xbf16, #tpu.memory_space<vmem>>, vector<1x96x128xbf16>
    %1 = vector.shape_cast %0 : vector<1x96x128xbf16> to vector<96x128xbf16>
    %c0_2 = arith.constant 0 : index
    %c0_3 = arith.constant 0 : index
    %2 = vector.load %arg2[%c0_2, %c0_3] : memref<128x128xbf16, #tpu.memory_space<vmem>>, vector<128x128xbf16>
    %cst = arith.constant dense<0.000000e+00> : vector<96x128xf32>
    %3 = tpu.matmul %1, %2, %cst {dimension_numbers = #tpu.dot_dimension_numbers<[1], [0], [0], [1], [0, 0, 1, 1], [], []>} : vector<96x128xbf16>, vector<128x128xbf16>, vector<96x128xf32> -> vector<96x128xf32>
    %c0_4 = arith.constant 0 : index
    %c0_5 = arith.constant 0 : index
    %4 = vector.load %arg3[%c0_4, %c0_5] : memref<1x128xf32, #tpu.memory_space<vmem>>, vector<1x128xf32>
    %5 = vector.broadcast %4 : vector<1x128xf32> to vector<96x128xf32>
    %6 = arith.mulf %3, %5 : vector<96x128xf32>
    %c0_6 = arith.constant 0 : index
    %c0_7 = arith.constant 0 : index
    %7 = vector.load %arg4[%c0_6, %c0_7] : memref<1x128xf32, #tpu.memory_space<vmem>>, vector<1x128xf32>
    %8 = vector.broadcast %7 : vector<1x128xf32> to vector<96x128xf32>
    %9 = arith.addf %6, %8 : vector<96x128xf32>
    %cst_8 = arith.constant 5.000000e-01 : f32
    %10 = vector.broadcast %cst_8 : f32 to vector<96x128xf32>
    %11 = arith.mulf %10, %9 : vector<96x128xf32>
    %cst_9 = arith.constant 0.707106769 : f32
    %12 = vector.broadcast %cst_9 : f32 to vector<96x128xf32>
    %13 = arith.mulf %9, %12 : vector<96x128xf32>
    %14 = math.erf %13 : vector<96x128xf32>
    %cst_10 = arith.constant 1.000000e+00 : f32
    %15 = vector.broadcast %cst_10 : f32 to vector<96x128xf32>
    %16 = arith.addf %15, %14 : vector<96x128xf32>
    %17 = arith.mulf %11, %16 : vector<96x128xf32>
    %18 = vector.shape_cast %17 : vector<96x128xf32> to vector<32x3x128xf32>
    %cst_11 = arith.constant dense<0xFF800000> : vector<32x128xf32>
    %19 = vector.multi_reduction <maximumf>, %18, %cst_11 [1] : vector<32x3x128xf32> to vector<32x128xf32>
    %20 = arith.truncf %19 : vector<32x128xf32> to vector<32x128xbf16>
    %c0_12 = arith.constant 0 : index
    %c0_13 = arith.constant 0 : index
    %c0_14 = arith.constant 0 : index
    %21 = vector.load %arg5[%c0_12, %c0_13, %c0_14] : memref<1x32x128xbf16, #tpu.memory_space<vmem>>, vector<1x32x128xbf16>
    %22 = vector.shape_cast %21 : vector<1x32x128xbf16> to vector<32x128xbf16>
    %23 = vector.shape_cast %20 : vector<32x128xbf16> to vector<1x32x128xbf16>
    tpu.vector_store %arg5[%c0_12, %c0_13, %c0_14], %23 {strides = array<i32>} : memref<1x32x128xbf16, #tpu.memory_space<vmem>>, vector<1x32x128xbf16>,
    return
  }
  func.func @transform_0(%arg0: i32) -> (i32, i32, i32) {
    %c0_i32 = arith.constant 0 : i32
    %c0_i32_0 = arith.constant 0 : i32
    %c0_i32_1 = arith.constant 0 : i32
    return %arg0, %c0_i32, %c0_i32_0 : i32, i32, i32
  }
  func.func @transform_1(%arg0: i32) -> (i32, i32) {
    %c0_i32 = arith.constant 0 : i32
    %c0_i32_0 = arith.constant 0 : i32
    %c0_i32_1 = arith.constant 0 : i32
    return %c0_i32, %c0_i32_0 : i32, i32
  }
  func.func @transform_2(%arg0: i32) -> (i32, i32) {
    %c0_i32 = arith.constant 0 : i32
    %c0_i32_0 = arith.constant 0 : i32
    %c0_i32_1 = arith.constant 0 : i32
    return %c0_i32, %c0_i32_0 : i32, i32
  }
  func.func @transform_3(%arg0: i32) -> (i32, i32) {
    %c0_i32 = arith.constant 0 : i32
    %c0_i32_0 = arith.constant 0 : i32
    %c0_i32_1 = arith.constant 0 : i32
    return %c0_i32, %c0_i32_0 : i32, i32
  }
  func.func @transform_4(%arg0: i32) -> (i32, i32, i32) {
    %c0_i32 = arith.constant 0 : i32
    %c0_i32_0 = arith.constant 0 : i32
    %c0_i32_1 = arith.constant 0 : i32
    return %arg0, %c0_i32, %c0_i32_0 : i32, i32, i32
  }
}

</mosaic_0001>

<bundles_post_ra>
// kernel: tpu_custom_call.1
= control target key start
LH: loop header
LB: loop body
LE: loop exit
PB: predicated region body
PF: predicated region fallthrough
CT: control target
= control target key end

     0   :  { %9 = vsyncpa [#allocation3], 0  ;;  %s3511_s0 = inlined_call_operand.hbm [shape: bf16[4,96,128], index: 0, kind: input, shape index: {}]   ;;  %s3512_s1 = inlined_call_operand.hbm [shape: bf16[128,128], index: 1, kind: input, shape index: {}]   ;;  %s3513_s2 = inlined_call_operand.vmem [shape: f32[1,128], index: 2, kind: input, shape index: {}]   ;;  %s3514_s3 = inlined_call_operand.vmem [shape: f32[1,128], index: 3, kind: input, shape index: {}]   ;;  %s3515_s4 = inlined_call_operand.hbm [shape: bf16[4,32,128], index: 4, kind: output, shape index: {}]  }
   0x1   :  { %11 = vsyncpa [#allocation3 + $0x1], 0 }
   0x2   :  { %12 = vsyncpa [#allocation6], 0 }
   0x3   :  { %13 = vsyncpa [#allocation4], 0 }
   0x4   :  { %15 = vsyncpa [#allocation4 + $0x1], 0  ;;  %s2846_s15 = smov 0   ;;  %s2848_s16 = smov 0  }
   0x5   :  { %s2850_s17 = smov 0   ;;  %s2852_s18 = smov 0  }
   0x6 LB: > { %s2867_s19 = sadd.s32 4294967295, %s2811_s18   ;;  %s2420_s20 = sadd.s32 4294967294, %s2811_s18   ;;  %s2811_s18 = sphi %s2852_s18, %s3534_s18   ;;  %s2807_s17 = sphi %s2850_s17, %s3533_s17   ;;  %s2803_s16 = sphi %s2848_s16, %s3532_s16   ;;  %s2799_s15 = sphi %s2846_s15, %s3531_s15  }
   0x7   : > { %p41_p0 = scmp.ne.s32.totalorder %s2803_s16, %s2799_s15  ;;  %p3516_p1 = scmp.eq.s32.totalorder %s2867_s19, 0 }
   0x8   : > { %p134_p3 = scmp.eq.s32.totalorder %s2420_s20, 3  ;;  %p2421_p5 = scmp.ge.s32.totalorder %s2811_s18, 1 }
   0x9   : > { %p2876_p4 = por %p3516_p1, %p41_p0  ;;  %p141_p7 = scmp.lt.s32.totalorder %s2811_s18, 5 }
   0xa   : > { %p2881_p6 = por %p134_p3, %p41_p0  ;;  %s2813_s24 = smov [#allocation5]  }
   0xb   : > { %s3519_s21 = scalar_select %p2876_p4, 1, 0 }
   0xc   : > { %s3520_s22 = scalar_select %p2881_p6, 1, 0 }
   0xd   : > { %p2886_p8 = pnand %p2421_p5, %p141_p7  ;;  %s153_s25 = sshll.u32 %s2813_s24, 4  ;;  %s154_s25 = int_to_ptr.vmem [resolvable:$true] %s153_s25 }
   0xe   : > { %s2899_s27 = sadd.s32 1, %s2811_s18   ;;  %s28_s28 = sadd.s32 1, %s2807_s17 }
   0xf   : > { %s3521_s23 = scalar_select %p2886_p8, 1, 0 }
  0x10   : > { %p2591_p9 = pneg %p2886_p8  ;;  %s25_s29 = ssub.s32 %s2811_s18, %s2899_s27 }
  0x11   : > { %s2683_s6 = scalar_lea.hbm %s3512_s1, 1024 }
  0x12   : > { %p2894_p10 = pnand %p2591_p9, %p3516_p1  ;;  %p2684_p11 = scmp.ne.s32.totalorder %s3512_s1, %s2683_s6 }
  0x13   : > { %p2690_p3 = scmp.lt.u32.totalorder %s2683_s6, %s3512_s1 }
  0x14   : > { %p2685_p12 = pneg %p2894_p10 }
  0x16   : > { %p2686_p13 = pnand %p2685_p12, %p2684_p11 }
  0x18   : > { %p2687_p0 = pneg %p2686_p13 }
  0x1a   : > { %p2692_p5 = pnand %p2690_p3, %p2687_p0 }
  0x1c   : > { %2695 = shalt.err (!%p2692_p5)
}
  0x1d   : > { %s2696_s11 = scalar_lea.vmem %s154_s25, 1024  ;;  %p2704_p2 = scmp.lt.s32.totalorder %s154_s25, %s154_s25 }
  0x1e   : > { %p2697_p7 = scmp.ne.s32.totalorder %s154_s25, %s2696_s11  ;;  %p2705_p6 = scmp.lt.s32.totalorder %s2696_s11, %s2696_s11 }
  0x20   : > { %p2699_p9 = pnand %p2697_p7, %p2685_p12  ;;  %p2706_p4 = por %p2705_p6, %p2704_p2 }
  0x22   : > { %p2700_p1 = pneg %p2699_p9 }
  0x24   : > { %p2707_p8 = pnand %p2706_p4, %p2700_p1 }
  0x26   : > { %2710 = shalt.err (!%p2707_p8)
}
  0x27   : > { %s2814_s12 = smov 64   ;;  %s2815_s13 = smov 4  }
  0x28   : > { %2594 = dma.hbm_to_vmem [thread:$0]  (!%p2894_p10), %s3512_s1, 1024, %s154_s25, [#allocation6], %s2814_s12, %s2814_s12, %s2815_s13  }
  0x29   : > { %p26_p1 = scmp.eq.s32.totalorder %s25_s29, 0  ;;  %p35_p2 = scmp.ne.s32.totalorder %s2807_s17, %s2803_s16 }
  0x2a   : > { %p36_p4 = scmp.eq.s32.totalorder %s2811_s18, 0  ;;  %p2604_p6 = scmp.lt.s32.totalorder %s2811_s18, 4 }
  0x2b   : > { %s2928_s24 = scalar_select %p26_p1, %s2807_s17, %s28_s28  }
  0x2c   : > { %p37_p8 = por %p36_p4, %p35_p2  ;;  %p3523_p11 = scmp.eq.s32.totalorder %s2867_s19, 3 }
  0x2d   : > { %s173_s26 = sand.u32 1, %s2807_s17   ;;  %s2581_s5 = smul.u32 768, %s2811_s18 }
  0x2e   : > { %p2932_p12 = por %p3523_p11, %p35_p2  ;;  %s2580_s6 = smul.u32 48, %s173_s26 }
  0x2f   : > { %p2938_p13 = pnand %p2604_p6, %p37_p8  ;;  %s2945_s28 = scalar_lea.hbm %s3511_s0, %s2581_s5 }
  0x30   : > { %s177_s8 = scalar_lea.vmem [#allocation2], %s2580_s6  ;;  %s2949_s10 = scalar_lea.sflag [#allocation3], %s173_s26 }
  0x31   : > { %s184_s9 = sshll.u32 %s177_s8, 4  ;;  %s2711_s11 = scalar_lea.hbm %s2945_s28, 768  ;;  %s2947_s9 = int_to_ptr.vmem [resolvable:$true] %s184_s9 }
  0x32   : > { %p2712_p10 = scmp.ne.s32.totalorder %s2945_s28, %s2711_s11  ;;  %p2713_p0 = pneg %p2938_p13 }
  0x33   : > { %s2716_s5 = scalar_lea.hbm %s3511_s0, 3072  ;;  %p2717_p7 = scmp.lt.u32.totalorder %s2945_s28, %s3511_s0 }
  0x34   : > { %p2714_p3 = pnand %p2713_p0, %p2712_p10  ;;  %p2718_p9 = scmp.lt.u32.totalorder %s2716_s5, %s2711_s11 }
  0x35   : > { %p2720_p2 = scmp.lt.u32.totalorder %s2711_s11, %s2945_s28 }
  0x36   : > { %p2715_p5 = pneg %p2714_p3  ;;  %p2719_p1 = por %p2718_p9, %p2717_p7 }
  0x38   : > { %p2721_p4 = por %p2720_p2, %p2719_p1 }
  0x3a   : > { %p2722_p6 = pnand %p2721_p4, %p2715_p5 }
  0x3c   : > { %2725 = shalt.err (!%p2722_p6)
}
  0x3d   : > { %s2726_s26 = scalar_lea.vmem %s2947_s9, 768  ;;  %s2816_s6 = smov [#allocation2]  }
  0x3e   : > { %p2727_p8 = scmp.ne.s32.totalorder %s2947_s9, %s2726_s26  ;;  %s2731_s8 = sshll.u32 %s2816_s6, 4  ;;  %s2732_s8 = int_to_ptr.vmem [resolvable:$false] %s2731_s8 }
  0x3f   : > { %s2733_s14 = scalar_lea.vmem %s2732_s8, 1536  ;;  %p2734_p3 = scmp.lt.s32.totalorder %s2947_s9, %s2732_s8 }
  0x40   : > { %p2729_p11 = pnand %p2727_p8, %p2713_p0  ;;  %p2735_p7 = scmp.lt.s32.totalorder %s2733_s14, %s2726_s26 }
  0x42   : > { %p2730_p10 = pneg %p2729_p11  ;;  %p2736_p9 = por %p2735_p7, %p2734_p3 }
  0x44   : > { %p2737_p1 = pnand %p2736_p9, %p2730_p10 }
  0x46   : > { %2740 = shalt.err (!%p2737_p1)
}
  0x47   : > { %2598 = dma.hbm_to_vmem [thread:$0]  (!%p2938_p13), %s2945_s28, 768, %s2947_s9, %s2949_s10, %s2814_s12, %s2814_s12, %s2815_s13  }
  0x48   : > { %p3526_p0 = scmp.ne.s32.totalorder %s3521_s23, 0 }
  0x49   : > { %s2983_s11 = sand.u32 (!%p3526_p0), 1, %s2803_s16   ;;  %p3527_p5 = scmp.ne.s32.totalorder (!%p3526_p0), %s3519_s21, 0 }
  0x4a   : > { %196 = sbr.rel (%p3526_p0) target bundleno = 541 (0x21d), region = 36  ;;  %s199_s5 = scalar_lea.sflag (!%p3526_p0), [#allocation3], %s2983_s11 }
  0x4b   : > { %s2582_s20 = smul.u32 (!%p3526_p0), 48, %s2983_s11 }
  0x4d   : > { %s2987_s25 = scalar_lea.vmem (!%p3526_p0), [#allocation2], %s2582_s20 }
  0x51   : > { %2786 = dma.done.wait (%p3527_p5), %s199_s5, 768  }
  0x52   : > { %2788 = vsyncadd (%p3527_p5), %s199_s5, 4294966528  ;;  %p3528_p13 = scmp.eq.s32.totalorder %s2867_s19, 0 }
  0x54   : > { %2790 = dma.done.wait (%p3528_p13), [#allocation6], 1024   ;;  %p3529_p2 = pmov %p3528_p13 }
  0x55   : > { %v2645_v0 = vld [vmem:[#allocation5] sm:$0xff]   ;;  %v2646_v1 = vld [vmem:[#allocation5 + $0x8] sm:$0xff]   ;;  %v2647_v2 = vld [vmem:[#allocation5 + $0x10] sm:$0xff]   ;;  %v2817_v36 = vmov 1966171168   ;;  %v539_v38 = vlaneseq  ;;  %vm1891_vm0 = vcmask 1042432  }
  0x56   : > { %2792 = vsyncadd (%p3529_p2), [#allocation6], 4294966272  ;;  %2536 = vmatprep.subr.bf16.mxu0 %v2645_v0  ;;  %2564 = vmatprep.subr.bf16.mxu1 %v2645_v0  ;;  %v2648_v3 = vld [vmem:[#allocation5 + $0x18] sm:$0xff]   ;;  %v2653_v4 = vld [vmem:[%s2987_s25] sm:$0xff]   ;;  %v537_v37 = vunpack.c.l.s4 %v2817_v36  ;;  %vm2276_vm1 = vcmask 1041409   ;;  %vm2278_vm2 = vcmask 1042434  }
  0x57   : > { %2537 = vmatpush3.bf16.msra.mxu0 %v2645_v0  ;;  %2572 = vmatpush3.bf16.msra.mxu1 %v2645_v0  ;;  %v2654_v5 = vld [vmem:[%s2987_s25 + $0x10] sm:$0xff]   ;;  %v2650_v7 = vld [vmem:[#allocation5 + $0x28] sm:$0xff]   ;;  %v2652_v9 = vld [vmem:[#allocation5 + $0x38] sm:$0xff]   ;;  %v540_v48 = vshrl.u32 %v539_v38, 7  ;;  %vm2280_vm3 = vcmask 1043459   ;;  %vm2282_vm4 = vcmask 1044484  }
  0x58   : > { %2538 = vmatprep.subr.bf16.mxu0 %v2646_v1  ;;  %2565 = vmatprep.subr.bf16.mxu1 %v2646_v1  ;;  %v2649_v6 = vld [vmem:[#allocation5 + $0x20] sm:$0xff]   ;;  %v2651_v8 = vld [vmem:[#allocation5 + $0x30] sm:$0xff]   ;;  %v2655_v10 = vld [vmem:[%s2987_s25 + $0x8] sm:$0xff]   ;;  %v538_v47 = vunpack.c.0.s8 %v537_v37  ;;  %vm2284_vm5 = vcmask 1045509   ;;  %vm2286_vm6 = vcmask 1046534   ;;  %vm2288_vm7 = vcmask 1047559  }
  0x59   : > { %2552 = vmatprep.mubr.bf16.mxu0 %v2653_v4  ;;  %2556 = vmatprep.mubr.bf16.mxu1 %v2654_v5  ;;  %v2656_v11 = vld [vmem:[%s2987_s25 + $0x18] sm:$0xff]   ;;  %v2657_v12 = vld [vmem:[%s2987_s25 + $0x20] sm:$0xff]   ;;  %v2658_v13 = vld [vmem:[%s2987_s25 + $0x28] sm:$0xff]   ;;  %s2427_s7 = sshll.u32 %s2983_s11, 4  ;;  %s2521_s9 = sshll.u32 %s2867_s19, 8 }
  0x5a   : > { %v3006_v14 = vld [vmem:[%s3513_s2] ss:$0 sm:$0xff]  ;;  %v3028_v54 = vsub.s32 %v538_v47, %v540_v48  ;;  %s3448_s28 = scalar_lea.vmem [#allocation7], %s2427_s7  ;;  %s3465_s6 = scalar_lea.hbm %s3515_s4, %s2521_s9 }
  0x5b   : > { %2539 = vmatpush3.bf16.msra.mxu0 %v2646_v1  ;;  %2573 = vmatpush3.bf16.msra.mxu1 %v2646_v1  ;;  %v3011_v16 = vld [vmem:[%s3514_s3] ss:$0 sm:$0xff]  ;;  %s2337_s10 = sshll.u32 %s3448_s28, 4  ;;  %s2324_s19 = scalar_lea.sflag [#allocation4], %s2983_s11  ;;  %s3467_s10 = int_to_ptr.vmem [resolvable:$true] %s2337_s10 }
  0x5c   : > { %2540 = vmatprep.subr.bf16.mxu0 %v2647_v2  ;;  %2566 = vmatprep.subr.bf16.mxu1 %v2647_v2  ;;  %s2741_s8 = scalar_lea.vmem %s3467_s10, 256  ;;  %s2818_s14 = smov [#allocation7]  }
  0x5d   : > { %p2742_p4 = scmp.ne.s32.totalorder %s3467_s10, %s2741_s8  ;;  %s2745_s20 = sshll.u32 %s2818_s14, 4  ;;  %s2746_s20 = int_to_ptr.vmem [resolvable:$false] %s2745_s20 }
  0x5e   : > { %s2747_s5 = scalar_lea.vmem %s2746_s20, 512  ;;  %p2748_p11 = scmp.lt.s32.totalorder %s3467_s10, %s2746_s20 }
  0x5f   : > { %2541 = vmatpush3.bf16.msra.mxu0 %v2647_v2  ;;  %2574 = vmatpush3.bf16.msra.mxu1 %v2647_v2  ;;  %p2743_p6 = pnand %p2742_p4, %p2932_p12  ;;  %p2749_p10 = scmp.lt.s32.totalorder %s2747_s5, %s2741_s8 }
  0x60   : > { %2542 = vmatprep.subr.bf16.mxu0 %v2648_v3  ;;  %2567 = vmatprep.subr.bf16.mxu1 %v2648_v3 }
  0x61   : > { %p2744_p8 = pneg %p2743_p6  ;;  %p2750_p3 = por %p2749_p10, %p2748_p11 }
  0x63   : > { %2543 = vmatpush3.bf16.msra.mxu0 %v2648_v3  ;;  %2575 = vmatpush3.bf16.msra.mxu1 %v2648_v3  ;;  %p2751_p7 = pnand %p2750_p3, %p2744_p8 }
  0x64   : > { %2544 = vmatprep.subr.bf16.mxu0 %v2649_v6  ;;  %2568 = vmatprep.subr.bf16.mxu1 %v2649_v6 }
  0x67   : > { %2545 = vmatpush3.bf16.msra.mxu0 %v2649_v6  ;;  %2576 = vmatpush3.bf16.msra.mxu1 %v2649_v6 }
  0x68   : > { %2546 = vmatprep.subr.bf16.mxu0 %v2650_v7  ;;  %2569 = vmatprep.subr.bf16.mxu1 %v2650_v7 }
  0x6b   : > { %2547 = vmatpush3.bf16.msra.mxu0 %v2650_v7  ;;  %2577 = vmatpush3.bf16.msra.mxu1 %v2650_v7 }
  0x6c   : > { %2548 = vmatprep.subr.bf16.mxu0 %v2651_v8  ;;  %2570 = vmatprep.subr.bf16.mxu1 %v2651_v8 }
  0x6f   : > { %2549 = vmatpush3.bf16.msra.mxu0 %v2651_v8  ;;  %2578 = vmatpush3.bf16.msra.mxu1 %v2651_v8 }
  0x70   : > { %2550 = vmatprep.subr.bf16.mxu0 %v2652_v9  ;;  %2571 = vmatprep.subr.bf16.mxu1 %v2652_v9 }
  0x73   : > { %2551 = vmatpush3.bf16.msra.mxu0 %v2652_v9  ;;  %2579 = vmatpush3.bf16.msra.mxu1 %v2652_v9 }
  0x76   : > { %2553 = vmatmul.mubr.bf16.vlgmr.msra.gmra.mrb[0].mxu0 %v2655_v10  ;;  %2557 = vmatmul.mubr.bf16.vlgmr.msra.gmra.mrb[0].mxu1 %v2656_v11 }
  0x77   : > { %2560 = vmatprep.mubr.bf16.mxu1 %v2657_v12 }
  0x7e   : > { %2561 = vmatmul.mubr.bf16.gmra.mrb[4].mxu1 %v2658_v13 }
 0x149   : > { %v2554_v15 = vpop.f32.mrb[0].mxu0  ;;  %v2558_v17 = vpop.f32.mrb[0].mxu1 }
 0x14a   : > { %v434_v18 = vmul.f32 %v2554_v15, %v3006_v14  ;;  %v438_v19 = vmul.f32 %v2558_v17, %v3006_v14  ;;  %v378_v20 = vpop.f32.mrb[1].mxu0  ;;  %v394_v21 = vpop.f32.mrb[1].mxu1 }
 0x14b   : > { %v432_v22 = vmul.f32 %v3006_v14, %v378_v20  ;;  %v436_v23 = vmul.f32 %v3006_v14, %v394_v21  ;;  %v2555_v24 = vpop.f32.mrb[2].mxu0  ;;  %v2559_v25 = vpop.f32.mrb[2].mxu1 }
 0x14c   : > { %v453_v26 = vadd.f32 %v3011_v16, %v434_v18  ;;  %v457_v27 = vadd.f32 %v3011_v16, %v438_v19  ;;  %v381_v28 = vpop.f32.mrb[3].mxu0  ;;  %v397_v29 = vpop.f32.mrb[3].mxu1  ;;  %v435_v35 = vmul.f32 %v2555_v24, %v3006_v14  ;;  %v439_v41 = vmul.f32 %v2559_v25, %v3006_v14 }
 0x14d   : > { %v451_v30 = vadd.f32 %v3011_v16, %v432_v22  ;;  %v455_v31 = vadd.f32 %v3011_v16, %v436_v23  ;;  %v433_v45 = vmul.f32 %v3006_v14, %v381_v28  ;;  %v437_v49 = vmul.f32 %v3006_v14, %v397_v29 }
 0x14e   : > { %v477_v32 = vmul.f32 0.70710677, %v453_v26  ;;  %v481_v33 = vmul.f32 0.70710677, %v457_v27  ;;  %v454_v44 = vadd.f32 %v3011_v16, %v435_v35  ;;  %v458_v50 = vadd.f32 %v3011_v16, %v439_v41 }
 0x14f   : > { %v475_v34 = vmul.f32 0.70710677, %v451_v30  ;;  %v479_v39 = vmul.f32 0.70710677, %v455_v31  ;;  %v452_v52 = vadd.f32 %v3011_v16, %v433_v45  ;;  %v465_v53 = vmul.f32 0.5, %v453_v26 }
 0x150   : > { %2659 = verf.f32 %v477_v32  ;;  %v478_v51 = vmul.f32 0.70710677, %v454_v44  ;;  %v456_v55 = vadd.f32 %v3011_v16, %v437_v49  ;;  %v469_v57 = vmul.f32 0.5, %v457_v27 }
 0x151   : > { %2661 = verf.f32 %v481_v33  ;;  %v2562_v40 = vpop.f32.mrb[4].mxu1  ;;  %v463_v58 = vmul.f32 0.5, %v451_v30  ;;  %v3031_v59 = vmul.f32 0.5, %v455_v31  ;;  %v482_v60 = vmul.f32 0.70710677, %v458_v50 }
 0x152   : > { %2663 = verf.f32 %v475_v34  ;;  %v410_v42 = vpop.f32.mrb[5].mxu1  ;;  %v3033_v63 = vmul.f32 0.5, %v454_v44  ;;  %v3035_v0 = vmul.f32 0.5, %v458_v50  ;;  %v3037_v1 = vmul.f32 0.5, %v452_v52 }
 0x153   : > { %v2563_v43 = vpop.f32.mrb[6].mxu1  ;;  %2665 = verf.f32 %v479_v39  ;;  %v476_v4 = vmul.f32 0.70710677, %v452_v52  ;;  %v442_v5 = vmul.f32 %v2562_v40, %v3006_v14  ;;  %v3040_v8 = vmul.f32 0.5, %v456_v55 }
 0x154   : > { %v413_v46 = vpop.f32.mrb[7].mxu1  ;;  %2667 = verf.f32 %v478_v51  ;;  %v480_v9 = vmul.f32 0.70710677, %v456_v55  ;;  %v440_v11 = vmul.f32 %v3006_v14, %v410_v42  ;;  %v3044_v12 = vmul.f32 %v2563_v43, %v3006_v14 }
 0x155   : > { %2669 = verf.f32 %v482_v60  ;;  %v3048_v19 = vmul.f32 %v3006_v14, %v413_v46  ;;  %v3052_v22 = vadd.f32 %v3011_v16, %v442_v5 }
 0x156   : > { %2671 = verf.f32 %v476_v4 }
 0x157   : > { %2673 = verf.f32 %v480_v9 }
 0x15a   : > { %v2660_v56 = vpop.eup %2659 }
 0x15b   : > { %v2662_v61 = vpop.eup %2661  ;;  %v501_v62 = vadd.f32 1.0, %v2660_v56 }
 0x15c   : > { %v2664_v2 = vpop.eup %2663  ;;  %v505_v3 = vadd.f32 1.0, %v2662_v61 }
 0x15d   : > { %v513_v6 = vmul.f32 %v501_v62, %v465_v53  ;;  %v499_v7 = vadd.f32 1.0, %v2664_v2  ;;  %v2666_v13 = vpop.eup %2665 }
 0x15e   : > { %v517_v10 = vmul.f32 %v505_v3, %v469_v57  ;;  %v503_v14 = vadd.f32 1.0, %v2666_v13  ;;  %v3070_v41 = vpop.eup %2667 }
 0x15f   : > { %v633_v15 = vcombine.high %v513_v6, %v513_v6  ;;  %v640_v17 = vrot.slane %v513_v6, %v3028_v54  ;;  %v511_v18 = vmul.f32 %v499_v7, %v463_v58  ;;  %v3080_v50 = vpop.eup %2669 }
 0x160   : > { %v829_v20 = vcombine.high %v517_v10, %v517_v10  ;;  %v836_v21 = vrot.slane %v517_v10, %v3028_v54  ;;  %v3089_v61 = vpop.eup %2671  ;;  %v3098_v10 = vadd.f32 %v3011_v16, %v440_v11 }
 0x161   : > { %v647_v23 = vrot.slane %v633_v15, %v3028_v54  ;;  %v648_v24 = vcombine.high %v640_v17, %v640_v17  ;;  %v535_v25 = vcombine.high %v511_v18, %v511_v18  ;;  %v3058_v30 = vrot.slane %v640_v17, %v3028_v54  ;;  %v3093_v5 = vpop.eup %2673 }
 0x162   : > { %v843_v26 = vrot.slane %v829_v20, %v3028_v54  ;;  %v844_v27 = vcombine.high %v836_v21, %v836_v21  ;;  %v852_v28 = vrot.slane %v836_v21, %v3028_v54  ;;  %v542_v36 = vrot.slane %v511_v18, %v3028_v54 }
 0x163   : > { %v649_v29 = vcombine.high %v647_v23, %v647_v23  ;;  %v663_v31 = vrot.slane %v647_v23, %v3028_v54  ;;  %v3062_v32 = vrot.slane %v648_v24, %v3028_v54  ;;  %v549_v40 = vrot.slane %v535_v25, %v3028_v54 }
 0x164   : > { %v845_v33 = vcombine.high %v843_v26, %v843_v26  ;;  %v866_v34 = vrot.slane %v844_v27, %v3028_v54  ;;  %v874_v35 = vcombine.high %v852_v28, %v852_v28  ;;  %v3073_v42 = vrot.slane %v843_v26, %v3028_v54 }
 0x165   : > { %v677_v37 = vrot.slane %v649_v29, %v3028_v54  ;;  %v679_v38 = vcombine.high %v663_v31, %v663_v31  ;;  %v2445_v39 = vcombine.high %v3058_v30, %v3062_v32  ;;  %v1275_v48 = vrot.slane %v663_v31, %v3028_v54 }
 0x166   : > { %v3076_v43 = vrot.slane %v845_v33, %v3028_v54  ;;  %v876_v44 = vcombine.high %v866_v34, %v866_v34  ;;  %v1491_v45 = vcombine.low %v852_v28, %v866_v34  ;;  %v1505_v52 = vrot.slane %v874_v35, %v3028_v54 }
 0x167   : > { %v681_v46 = vcombine.high %v677_v37, %v677_v37  ;;  %v1268_v47 = vrot.slane %v2445_v39, %v3028_v54  ;;  %v1284_v49 = vcombine.low %v677_v37, %v679_v38  ;;  %v550_v60 = vcombine.high %v542_v36, %v542_v36 }
 0x168   : > { %v1498_v51 = vrot.slane %v1491_v45, %v3028_v54  ;;  %v1514_v53 = vcombine.low %v876_v44, %v3073_v42  ;;  %v1528_v55 = vrot.slane %v3076_v43, %v3028_v54  ;;  %v551_v3 = vcombine.high %v549_v40, %v549_v40 }
 0x169   : > { %v1276_v56 = vcombine.low %v1268_v47, %v1275_v48  ;;  %v1291_v57 = vrot.slane %v1284_v49, %v3028_v54  ;;  %v1298_v58 = vrot.slane %v681_v46, %v3028_v54  ;;  %v558_v4 = vrot.slane %v542_v36, %v3028_v54 }
 0x16a   : > { %v1506_v62 = vcombine.low %v1498_v51, %v1505_v52  ;;  %v1521_v2 = vrot.slane %v1514_v53, %v3028_v54  ;;  %v572_v9 = vrot.slane %v550_v60, %v3028_v54  ;;  %v3102_v17 = vrot.slane %v551_v3, %v3028_v54 }
 0x16b   : > { %v1283_v6 = vrot.slane %v1276_v56, %v3028_v54  ;;  %v1299_v7 = vcombine.low %v1291_v57, %v1298_v58  ;;  %v580_v18 = vcombine.high %v558_v4, %v558_v4  ;;  %v3106_v21 = vrot.slane %v549_v40, %v3028_v54 }
 0x16c   : > { %v1513_v13 = vrot.slane %v1506_v62, %v3028_v54  ;;  %v1529_v15 = vcombine.low %v1521_v2, %v1528_v55  ;;  %v582_v23 = vcombine.high %v572_v9, %v572_v9  ;;  %v1123_v24 = vcombine.low %v558_v4, %v572_v9 }
 0x16d   : > { %v1934_v20 = vsel %vm1891_vm0, %v1283_v6, -inf  ;;  %v1306_v25 = vrot.slane %v1299_v7, %v3028_v54  ;;  %v515_v27 = vmul.f32 %v503_v14, %v3031_v59  ;;  %v1137_v31 = vrot.slane %v580_v18, %v3028_v54 }
 0x16e   : > { %v1536_v26 = vrot.slane %v1529_v15, %v3028_v54  ;;  %v2004_v11 = vsel %vm1891_vm0, %v1513_v13, -inf  ;;  %v1130_v29 = vrot.slane %v1123_v24, %v3028_v54  ;;  %v1146_v33 = vcombine.low %v582_v23, %v3106_v21 }
 0x16f   : > { %v2005_v28 = vrot.slane %v2004_v11, 4  ;;  %v1935_v34 = vrot.slane %v1934_v20, 4  ;;  %v1160_v36 = vrot.slane %v3102_v17, %v3028_v54  ;;  %v3120_v37 = vadd.f32 %v3011_v16, %v3044_v12 }
 0x170   : > { %v2011_v35 = vsel %vm1891_vm0, %v1536_v26, -inf  ;;  %v1138_v59 = vcombine.low %v1130_v29, %v1137_v31  ;;  %v1153_v14 = vrot.slane %v1146_v33, %v3028_v54  ;;  %v1941_v40 = vsel %vm1891_vm0, %v1306_v25, -inf }
 0x171   : > { %v2006_v38 = vmax.f32 %v2004_v11, %v2005_v28  ;;  %v2012_v39 = vrot.slane %v2011_v35, 4  ;;  %v731_v44 = vcombine.high %v515_v27, %v515_v27  ;;  %v485_v45 = vmul.f32 0.70710677, %v3052_v22 }
 0x172   : > { %v3127_v46 = vadd.f32 %v3011_v16, %v3048_v19  ;;  %v1145_v49 = vrot.slane %v1138_v59, %v3028_v54  ;;  %v1161_v12 = vcombine.low %v1153_v14, %v1160_v36  ;;  %v1936_v51 = vmax.f32 %v1934_v20, %v1935_v34 }
 0x173   : > { %v2007_v47 = vrot.slane %v2006_v38, 2  ;;  %v2013_v48 = vmax.f32 %v2011_v35, %v2012_v39  ;;  %v738_v52 = vrot.slane %v515_v27, %v3028_v54  ;;  %v745_v53 = vrot.slane %v731_v44, %v3028_v54 }
 0x174   : > { %v483_v55 = vmul.f32 0.70710677, %v3098_v10  ;;  %v1168_v58 = vrot.slane %v1161_v12, %v3028_v54  ;;  %v1892_v60 = vsel %vm1891_vm0, %v1145_v49, -inf  ;;  %v1942_v16 = vrot.slane %v1941_v40, 4 }
 0x175   : > { %v2008_v56 = vmax.f32 %v2006_v38, %v2007_v47  ;;  %v2014_v57 = vrot.slane %v2013_v48, 2  ;;  %v1893_v19 = vrot.slane %v1892_v60, 4  ;;  %v746_v62 = vcombine.high %v738_v52, %v738_v52 }
 0x176   : > { %v3136_v2 = vmul.f32 0.5, %v3052_v22  ;;  %v1899_v6 = vsel %vm1891_vm0, %v1168_v58, -inf  ;;  %v747_v7 = vcombine.high %v745_v53, %v745_v53  ;;  %v1937_v9 = vrot.slane %v1936_v51, 2 }
 0x177   : > { %v2009_v3 = vrot.slane %v2008_v56, 1  ;;  %v2015_v4 = vmax.f32 %v2013_v48, %v2014_v57  ;;  %v1894_v13 = vmax.f32 %v1892_v60, %v1893_v19  ;;  %v1900_v15 = vrot.slane %v1899_v6, 4 }
 0x178   : > { %2675 = verf.f32 %v485_v45  ;;  %v3140_v20 = vrot.slane %v738_v52, %v3028_v54  ;;  %v761_v23 = vrot.slane %v745_v53, %v3028_v54  ;;  %v502_v26 = vadd.f32 1.0, %v3070_v41 }
 0x179   : > { %v2016_v18 = vrot.slane %v2015_v4, 1  ;;  %2677 = verf.f32 %v483_v55  ;;  %v2010_v24 = vmax.f32 %v2008_v56, %v2009_v3  ;;  %v1895_v22 = vrot.slane %v1894_v13, 2 }
 0x17a   : > { %v1901_v25 = vmax.f32 %v1899_v6, %v1900_v15  ;;  %v3144_v11 = vmax.f32 %v1941_v40, %v1942_v16  ;;  %v768_v28 = vrot.slane %v746_v62, %v3028_v54  ;;  %v3148_v29 = vrot.slane %v747_v7, %v3028_v54 }
 0x17b   : > { %v2017_v27 = vmax.f32 %v2015_v4, %v2016_v18  ;;  %v3150_v31 = vmax.f32 %v1936_v51, %v1937_v9  ;;  %v1896_v33 = vmax.f32 %v1894_v13, %v1895_v22  ;;  %v506_v35 = vadd.f32 1.0, %v3080_v50 }
 0x17c   : > { %v1902_v34 = vrot.slane %v1901_v25, 2  ;;  %v1252_v36 = vrot.slane %v3062_v32, %v3028_v54  ;;  %v776_v41 = vcombine.high %v3140_v20, %v3140_v20  ;;  %v777_v39 = vcombine.high %v761_v23, %v761_v23 }
 0x17d   : > { %v2506_v38 = vpack.c.bf16 %v2017_v27, %v2017_v27  ;;  %v2448_v59 = vcombine.high %v3073_v42, %v3076_v43  ;;  %v2505_v14 = vpack.c.bf16 %v2010_v24, %v2010_v24  ;;  %v778_v44 = vcombine.high %v768_v28, %v768_v28 }
 0x17e   : > { %v1903_v40 = vmax.f32 %v1901_v25, %v1902_v34  ;;  %v1944_v45 = vrot.slane %v3144_v11, 2  ;;  %v2444_v47 = vcombine.high %v3106_v21, %v3102_v17  ;;  %v1376_v50 = vcombine.low %v768_v28, %v776_v41 }
 0x17f   : > { %v1399_v48 = vcombine.low %v761_v23, %v3148_v29  ;;  %v1939_v49 = vrot.slane %v3150_v31, 1  ;;  %v2261_v12 = vunpack.c.l.b16 %v2506_v38  ;;  %v1897_v51 = vrot.slane %v1896_v33, 1 }
 0x180   : > { %v1390_v52 = vrot.slane %v778_v44, %v3028_v54  ;;  %v1383_v53 = vrot.slane %v1376_v50, %v3028_v54  ;;  %v1413_v43 = vrot.slane %v777_v39, %v3028_v54  ;;  %v514_v55 = vmul.f32 %v502_v26, %v3033_v63 }
 0x181   : > { %v1406_v42 = vrot.slane %v1399_v48, %v3028_v54  ;;  %v2260_v57 = vunpack.c.l.b16 %v2505_v14  ;;  %v1904_v58 = vrot.slane %v1903_v40, 1  ;;  %v1367_v60 = vrot.slane %v3140_v20, %v3028_v54 }
 0x182   : > { %v3169_v56 = vpop.eup %2675  ;;  %v518_v16 = vmul.f32 %v506_v35, %v3035_v0  ;;  %v1391_v62 = vcombine.low %v1383_v53, %v1390_v52  ;;  %v682_v4 = vcombine.high %v514_v55, %v514_v55  ;;  %v689_v6 = vrot.slane %v514_v55, %v3028_v54 }
 0x183   : > { %v3174_v19 = vpop.eup %2677  ;;  %v1414_v3 = vcombine.low %v1406_v42, %v1413_v43  ;;  %v3178_v7 = vsel %vm2276_vm1, %v2261_v12, %v2260_v57  ;;  %v3180_v63 = vmax.f32 %v1896_v33, %v1897_v51  ;;  %v3186_v23 = vmax.f32 %v1903_v40, %v1904_v58 }
 0x184   : > { %v878_v9 = vcombine.high %v518_v16, %v518_v16  ;;  %v885_v13 = vrot.slane %v518_v16, %v3028_v54  ;;  %v1398_v15 = vrot.slane %v1391_v62, %v3028_v54  ;;  %v696_v0 = vrot.slane %v682_v4, %v3028_v54 }
 0x185   : > { %v1421_v18 = vrot.slane %v1414_v3, %v3028_v54  ;;  %v697_v20 = vcombine.high %v689_v6, %v689_v6  ;;  %v705_v24 = vrot.slane %v689_v6, %v3028_v54  ;;  %v1544_v25 = vrot.slane %v2448_v59, %v3028_v54 }
 0x186   : > { %v892_v22 = vrot.slane %v878_v9, %v3028_v54  ;;  %v1969_v26 = vsel %vm1891_vm0, %v1398_v15, -inf  ;;  %v698_v28 = vcombine.high %v696_v0, %v696_v0  ;;  %v893_v33 = vcombine.high %v885_v13, %v885_v13 }
 0x187   : > { %v1976_v27 = vsel %vm1891_vm0, %v1421_v18, -inf  ;;  %v1970_v34 = vrot.slane %v1969_v26, 4  ;;  %v712_v38 = vrot.slane %v696_v0, %v3028_v54  ;;  %v719_v41 = vrot.slane %v697_v20, %v3028_v54 }
 0x188   : > { %v1977_v35 = vrot.slane %v1976_v27, 4  ;;  %v726_v39 = vrot.slane %v698_v28, %v3028_v54  ;;  %v727_v14 = vcombine.high %v705_v24, %v705_v24  ;;  %v894_v40 = vcombine.high %v892_v22, %v892_v22 }
 0x189   : > { %v901_v44 = vrot.slane %v885_v13, %v3028_v54  ;;  %v1971_v50 = vmax.f32 %v1969_v26, %v1970_v34  ;;  %v729_v48 = vcombine.high %v719_v41, %v719_v41  ;;  %v1307_v12 = vcombine.low %v705_v24, %v719_v41 }
 0x18a   : > { %v1978_v59 = vmax.f32 %v1976_v27, %v1977_v35  ;;  %v1321_v51 = vrot.slane %v727_v14, %v3028_v54  ;;  %v1344_v52 = vrot.slane %v726_v39, %v3028_v54  ;;  %v2446_v53 = vcombine.high %v712_v38, %v726_v39 }
 0x18b   : > { %v908_v42 = vrot.slane %v892_v22, %v3028_v54  ;;  %v1972_v43 = vrot.slane %v1971_v50, 2  ;;  %v1314_v57 = vrot.slane %v1307_v12, %v3028_v54  ;;  %v1330_v58 = vcombine.low %v729_v48, %v712_v38 }
 0x18c   : > { %v1979_v55 = vrot.slane %v1978_v59, 2  ;;  %v1360_v16 = vrot.slane %v2446_v53, %v3028_v54  ;;  %v915_v62 = vrot.slane %v893_v33, %v3028_v54  ;;  %v3204_v3 = vrot.slane %v894_v40, %v3028_v54 }
 0x18d   : > { %v923_v4 = vcombine.high %v901_v44, %v901_v44  ;;  %v1973_v6 = vmax.f32 %v1971_v50, %v1972_v43  ;;  %v1322_v13 = vcombine.low %v1314_v57, %v1321_v51  ;;  %v1337_v15 = vrot.slane %v1330_v58, %v3028_v54 }
 0x18e   : > { %v1980_v9 = vmax.f32 %v1978_v59, %v1979_v55  ;;  %v1368_v18 = vcombine.low %v1360_v16, %v1367_v60  ;;  %v924_v0 = vcombine.high %v908_v42, %v908_v42  ;;  %v925_v20 = vcombine.high %v915_v62, %v915_v62 }
 0x18f   : > { %v1551_v24 = vrot.slane %v901_v44, %v3028_v54  ;;  %v1974_v22 = vrot.slane %v1973_v6, 1  ;;  %v1329_v27 = vrot.slane %v1322_v13, %v3028_v54  ;;  %v1345_v28 = vcombine.low %v1337_v15, %v1344_v52 }
 0x190   : > { %v1981_v26 = vrot.slane %v1980_v9, 1  ;;  %v1375_v33 = vrot.slane %v1368_v18, %v3028_v54  ;;  %v1560_v35 = vcombine.low %v915_v62, %v923_v4  ;;  %v1574_v38 = vrot.slane %v925_v20, %v3028_v54 }
 0x191   : > { %v1552_v34 = vcombine.low %v1544_v25, %v1551_v24  ;;  %v1975_v41 = vmax.f32 %v1973_v6, %v1974_v22  ;;  %v1352_v60 = vrot.slane %v1345_v28, %v3028_v54  ;;  %v1948_v14 = vsel %vm1891_vm0, %v1329_v27, -inf }
 0x192   : > { %v3211_v39 = vmax.f32 %v1980_v9, %v1981_v26  ;;  %v2489_v40 = vpack.c.bf16 %v3180_v63, %v3180_v63  ;;  %v1949_v44 = vrot.slane %v1948_v14, 4  ;;  %v1962_v50 = vsel %vm1891_vm0, %v1375_v33, -inf }
 0x193   : > { %v1567_v59 = vrot.slane %v1560_v35, %v3028_v54  ;;  %v2500_v48 = vpack.c.bf16 %v1975_v41, %v1975_v41  ;;  %v1955_v25 = vsel %vm1891_vm0, %v1352_v60, -inf  ;;  %v1963_v12 = vrot.slane %v1962_v50, 4 }
 0x194   : > { %v1559_v51 = vrot.slane %v1552_v34, %v3028_v54  ;;  %v1950_v52 = vmax.f32 %v1948_v14, %v1949_v44  ;;  %v1956_v53 = vrot.slane %v1955_v25, 4  ;;  %v1583_v55 = vcombine.low %v908_v42, %v3204_v3 }
 0x195   : > { %v1575_v43 = vcombine.low %v1567_v59, %v1574_v38  ;;  %v2501_v57 = vpack.c.bf16 %v3211_v39, %v3211_v39  ;;  %v3224_v58 = vunpack.c.l.b16 %v2500_v48  ;;  %v1964_v16 = vmax.f32 %v1962_v50, %v1963_v12 }
 0x196   : > { %v1597_v62 = vrot.slane %v924_v0, %v3028_v54  ;;  %v1951_v4 = vrot.slane %v1950_v52, 2  ;;  %v1957_v6 = vmax.f32 %v1955_v25, %v1956_v53  ;;  %v1590_v13 = vrot.slane %v1583_v55, %v3028_v54 }
 0x197   : > { %v1582_v9 = vrot.slane %v1575_v43, %v3028_v54  ;;  %v1965_v15 = vrot.slane %v1964_v16, 2  ;;  %v2018_v18 = vsel %vm1891_vm0, %v1559_v51, -inf  ;;  %v500_v20 = vadd.f32 1.0, %v3089_v61 }
 0x198   : > { %v3235_v42 = vrot.slane %v2444_v47, %v3028_v54  ;;  %v1952_v24 = vmax.f32 %v1950_v52, %v1951_v4  ;;  %v1958_v22 = vrot.slane %v1957_v6, 2  ;;  %v1598_v0 = vcombine.low %v1590_v13, %v1597_v62 }
 0x199   : > { %v2019_v26 = vrot.slane %v2018_v18, 4  ;;  %v1966_v27 = vmax.f32 %v1964_v16, %v1965_v15  ;;  %v2025_v28 = vsel %vm1891_vm0, %v1582_v9, -inf  ;;  %v512_v33 = vmul.f32 %v500_v20, %v3037_v1 }
 0x19a   : > { %v3240_v34 = vadd.f32 1.0, %v3093_v5  ;;  %v1953_v35 = vrot.slane %v1952_v24, 1  ;;  %v1959_v61 = vmax.f32 %v1957_v6, %v1958_v22  ;;  %v1605_v38 = vrot.slane %v1598_v0, %v3028_v54 }
 0x19b   : > { %v2020_v41 = vmax.f32 %v2018_v18, %v2019_v26  ;;  %v1967_v17 = vrot.slane %v1966_v27, 1  ;;  %v2026_v21 = vrot.slane %v2025_v28, 4  ;;  %v584_v47 = vcombine.high %v512_v33, %v512_v33 }
 0x19c   : > { %v591_v60 = vrot.slane %v512_v33, %v3028_v54  ;;  %v1954_v14 = vmax.f32 %v1952_v24, %v1953_v35  ;;  %v1960_v44 = vrot.slane %v1959_v61, 1  ;;  %v2032_v59 = vsel %vm1891_vm0, %v1605_v38, -inf }
 0x19d   : > { %v2021_v50 = vrot.slane %v2020_v41, 2  ;;  %v1968_v1 = vmax.f32 %v1966_v27, %v1967_v17  ;;  %v2027_v5 = vmax.f32 %v2025_v28, %v2026_v21  ;;  %v2033_v48 = vrot.slane %v2032_v59, 4 }
 0x19e   : > { %v598_v25 = vrot.slane %v584_v47, %v3028_v54  ;;  %v1961_v12 = vmax.f32 %v1959_v61, %v1960_v44  ;;  %v2497_v51 = vpack.c.bf16 %v1954_v14, %v1954_v14  ;;  %v599_v53 = vcombine.high %v591_v60, %v591_v60 }
 0x19f   : > { %v2022_v52 = vmax.f32 %v2020_v41, %v2021_v50  ;;  %v2499_v43 = vpack.c.bf16 %v1968_v1, %v1968_v1  ;;  %v2028_v55 = vrot.slane %v2027_v5, 2  ;;  %v2034_v16 = vmax.f32 %v2032_v59, %v2033_v48 }
 0x1a0   : > { %v600_v62 = vcombine.high %v598_v25, %v598_v25  ;;  %v2498_v4 = vpack.c.bf16 %v1961_v12, %v1961_v12  ;;  %v2252_v6 = vunpack.c.l.b16 %v2497_v51  ;;  %v607_v13 = vrot.slane %v591_v60, %v3028_v54 }
 0x1a1   : > { %v2023_v9 = vrot.slane %v2022_v52, 1  ;;  %v2254_v15 = vunpack.c.l.b16 %v2499_v43  ;;  %v2029_v18 = vmax.f32 %v2027_v5, %v2028_v55  ;;  %v2035_v20 = vrot.slane %v2034_v16, 2 }
 0x1a2   : > { %v614_v24 = vrot.slane %v598_v25, %v3028_v54  ;;  %v2253_v22 = vunpack.c.l.b16 %v2498_v4  ;;  %v621_v26 = vrot.slane %v599_v53, %v3028_v54  ;;  %v628_v27 = vrot.slane %v600_v62, %v3028_v54 }
 0x1a3   : > { %v2024_v0 = vmax.f32 %v2022_v52, %v2023_v9  ;;  %v2030_v28 = vrot.slane %v2029_v18, 1  ;;  %v2036_v33 = vmax.f32 %v2034_v16, %v2035_v20  ;;  %v629_v35 = vcombine.high %v607_v13, %v607_v13 }
 0x1a4   : > { %v630_v61 = vcombine.high %v614_v24, %v614_v24  ;;  %v2290_v38 = vsel %vm2276_vm1, %v2253_v22, %v2252_v6  ;;  %v631_v17 = vcombine.high %v621_v26, %v621_v26  ;;  %v632_v21 = vcombine.high %v628_v27, %v628_v27 }
 0x1a5   : > { %v2507_v41 = vpack.c.bf16 %v2024_v0, %v2024_v0  ;;  %v2291_v47 = vsel %vm2278_vm2, %v2254_v15, %v2290_v38  ;;  %v2031_v60 = vmax.f32 %v2029_v18, %v2030_v28  ;;  %v2037_v14 = vrot.slane %v2036_v33, 1 }
 0x1a6   : > { %v1183_v44 = vrot.slane %v607_v13, %v3028_v54  ;;  %v2292_v50 = vsel %vm2280_vm3, %v3224_v58, %v2291_v47  ;;  %v1192_v1 = vcombine.low %v621_v26, %v629_v35  ;;  %v1206_v5 = vrot.slane %v631_v17, %v3028_v54 }
 0x1a7   : > { %v2262_v59 = vunpack.c.l.b16 %v2507_v41  ;;  %v2038_v48 = vmax.f32 %v2036_v33, %v2037_v14  ;;  %v2508_v25 = vpack.c.bf16 %v2031_v60, %v2031_v60  ;;  %v1215_v51 = vcombine.low %v614_v24, %v628_v27 }
 0x1a8   : > { %v1184_v12 = vcombine.low %v3235_v42, %v1183_v44  ;;  %v1199_v53 = vrot.slane %v1192_v1, %v3028_v54  ;;  %v1229_v43 = vrot.slane %v630_v61, %v3028_v54  ;;  %v1238_v55 = vcombine.low %v632_v21, %v3058_v30 }
 0x1a9   : > { %v2298_v52 = vsel %vm2278_vm2, %v2262_v59, %v3178_v7  ;;  %v2509_v16 = vpack.c.bf16 %v2038_v48, %v2038_v48  ;;  %v2263_v58 = vunpack.c.l.b16 %v2508_v25  ;;  %v1222_v4 = vrot.slane %v1215_v51, %v3028_v54 }
 0x1aa   : > { %v1191_v62 = vrot.slane %v1184_v12, %v3028_v54  ;;  %v2256_v42 = vunpack.c.l.b16 %v2501_v57  ;;  %v1207_v6 = vcombine.low %v1199_v53, %v1206_v5  ;;  %v1245_v9 = vrot.slane %v1238_v55, %v3028_v54 }
 0x1ab   : > { %v516_v7 = vmul.f32 %v3240_v34, %v3040_v8  ;;  %v2264_v13 = vunpack.c.l.b16 %v2509_v16  ;;  %v2299_v15 = vsel %vm2280_vm3, %v2263_v58, %v2298_v52  ;;  %v1230_v30 = vcombine.low %v1222_v4, %v1229_v43 }
 0x1ac   : > { %v1906_v18 = vsel %vm1891_vm0, %v1191_v62, -inf  ;;  %v1214_v20 = vrot.slane %v1207_v6, %v3028_v54  ;;  %v1253_v24 = vcombine.low %v1245_v9, %v1252_v36  ;;  %v3282_v34 = vsel %vm2282_vm4, %v2256_v42, %v2292_v50 }
 0x1ad   : > { %v1907_v39 = vrot.slane %v1906_v18, 4  ;;  %v780_v57 = vcombine.high %v516_v7, %v516_v7  ;;  %v3277_v22 = vsel %vm2282_vm4, %v2264_v13, %v2299_v15  ;;  %v1237_v0 = vrot.slane %v1230_v30, %v3028_v54 }
 0x1ae   : > { %v787_v8 = vrot.slane %v516_v7, %v3028_v54  ;;  %v1913_v27 = vsel %vm1891_vm0, %v1214_v20, -inf  ;;  %v779_v28 = vcombine.high %v3148_v29, %v3148_v29  ;;  %v2490_v36 = vpack.c.bf16 %v3186_v23, %v3186_v23 }
 0x1af   : > { %v1908_v26 = vmax.f32 %v1906_v18, %v1907_v39  ;;  %v794_v32 = vrot.slane %v780_v57, %v3028_v54  ;;  %v1914_v33 = vrot.slane %v1913_v27, 4  ;;  %v1920_v35 = vsel %vm1891_vm0, %v1237_v0, -inf }
 0x1b0   : > { %v795_v61 = vcombine.high %v787_v8, %v787_v8  ;;  %v1921_v41 = vrot.slane %v1920_v35, 4  ;;  %v803_v21 = vrot.slane %v787_v8, %v3028_v54  ;;  %v1260_v47 = vrot.slane %v1253_v24, %v3028_v54 }
 0x1b1   : > { %v1909_v38 = vrot.slane %v1908_v26, 2  ;;  %v796_v17 = vcombine.high %v794_v32, %v794_v32  ;;  %v1915_v60 = vmax.f32 %v1913_v27, %v1914_v33  ;;  %v810_v14 = vrot.slane %v794_v32, %v3028_v54 }
 0x1b2   : > { %v817_v29 = vrot.slane %v795_v61, %v3028_v54  ;;  %v1922_v50 = vmax.f32 %v1920_v35, %v1921_v41  ;;  %v1422_v59 = vcombine.low %v779_v28, %v803_v21  ;;  %v2244_v1 = vunpack.c.l.b16 %v2489_v40 }
 0x1b3   : > { %v1910_v44 = vmax.f32 %v1908_v26, %v1909_v38  ;;  %v824_v23 = vrot.slane %v796_v17, %v3028_v54  ;;  %v1916_v5 = vrot.slane %v1915_v60, 2  ;;  %v826_v48 = vcombine.high %v810_v14, %v810_v14 }
 0x1b4   : > { %v1436_v25 = vrot.slane %v817_v29, %v3028_v54  ;;  %v1923_v51 = vrot.slane %v1922_v50, 2  ;;  %v1429_v53 = vrot.slane %v1422_v59, %v3028_v54  ;;  %v2245_v43 = vunpack.c.l.b16 %v2490_v36 }
 0x1b5   : > { %v1911_v12 = vrot.slane %v1910_v44, 1  ;;  %v828_v52 = vcombine.high %v824_v23, %v824_v23  ;;  %v1917_v55 = vmax.f32 %v1915_v60, %v1916_v5  ;;  %v1927_v16 = vsel %vm1891_vm0, %v1260_v47, -inf }
 0x1b6   : > { %v2447_v58 = vcombine.high %v803_v21, %v817_v29  ;;  %v1924_v4 = vmax.f32 %v1922_v50, %v1923_v51  ;;  %v1437_v42 = vcombine.low %v1429_v53, %v1436_v25  ;;  %v1468_v6 = vcombine.low %v824_v23, %v826_v48 }
 0x1b7   : > { %v1912_v62 = vmax.f32 %v1910_v44, %v1911_v12  ;;  %v1918_v63 = vrot.slane %v1917_v55, 1  ;;  %v1459_v9 = vrot.slane %v810_v14, %v3028_v54  ;;  %v1482_v7 = vrot.slane %v828_v52, %v3028_v54 }
 0x1b8   : > { %v1452_v40 = vrot.slane %v2447_v58, %v3028_v54  ;;  %v1925_v13 = vrot.slane %v1924_v4, 1  ;;  %v1444_v30 = vrot.slane %v1437_v42, %v3028_v54  ;;  %v1475_v18 = vrot.slane %v1468_v6, %v3028_v54 }
 0x1b9   : > { %v2491_v15 = vpack.c.bf16 %v1912_v62, %v1912_v62  ;;  %v2277_v20 = vsel %vm2276_vm1, %v2245_v43, %v2244_v1  ;;  %v1919_v24 = vmax.f32 %v1917_v55, %v1918_v63  ;;  %v509_v57 = vadd.f32 1.0, %v3169_v56 }
 0x1ba   : > { %v1460_v39 = vcombine.low %v1452_v40, %v1459_v9  ;;  %v1926_v0 = vmax.f32 %v1924_v4, %v1925_v13  ;;  %v1928_v8 = vrot.slane %v1927_v16, 4  ;;  %v1983_v27 = vsel %vm1891_vm0, %v1444_v30, -inf }
 0x1bb   : > { %v2246_v26 = vunpack.c.l.b16 %v2491_v15  ;;  %v2492_v28 = vpack.c.bf16 %v1919_v24, %v1919_v24  ;;  %v1483_v36 = vcombine.low %v1475_v18, %v1482_v7  ;;  %v1984_v33 = vrot.slane %v1983_v27, 4 }
 0x1bc   : > { %v1467_v32 = vrot.slane %v1460_v39, %v3028_v54  ;;  %v1945_v35 = vmax.f32 %v3144_v11, %v1944_v45  ;;  %v2493_v61 = vpack.c.bf16 %v1926_v0, %v1926_v0  ;;  %v521_v41 = vmul.f32 %v509_v57, %v3136_v2 }
 0x1bd   : > { %v2279_v38 = vsel %vm2278_vm2, %v2246_v26, %v2277_v20  ;;  %v2247_v56 = vunpack.c.l.b16 %v2492_v28  ;;  %v1985_v17 = vmax.f32 %v1983_v27, %v1984_v33  ;;  %v486_v47 = vmul.f32 0.70710677, %v3120_v37 }
 0x1be   : > { %v1990_v21 = vsel %vm1891_vm0, %v1467_v32, -inf  ;;  %v1940_v60 = vmax.f32 %v3150_v31, %v1939_v49  ;;  %v1929_v14 = vmax.f32 %v1927_v16, %v1928_v8  ;;  %v2248_v29 = vunpack.c.l.b16 %v2493_v61 }
 0x1bf   : > { %v1991_v44 = vrot.slane %v1990_v21, 4  ;;  %v2281_v11 = vsel %vm2280_vm3, %v2247_v56, %v2279_v38  ;;  %v1490_v45 = vrot.slane %v1483_v36, %v3028_v54  ;;  %v1986_v50 = vrot.slane %v1985_v17, 2 }
 0x1c0   : > { %v1025_v23 = vcombine.high %v521_v41, %v521_v41  ;;  %v1946_v2 = vrot.slane %v1945_v35, 1  ;;  %v3324_v59 = vsel %vm2282_vm4, %v2248_v29, %v2281_v11  ;;  %v1032_v5 = vrot.slane %v521_v41, %v3028_v54 }
 0x1c1   : > { %v1992_v1 = vmax.f32 %v1990_v21, %v1991_v44  ;;  %v1987_v48 = vmax.f32 %v1985_v17, %v1986_v50  ;;  %v471_v25 = vmul.f32 0.5, %v3098_v10  ;;  %v507_v31 = vadd.f32 1.0, %v3174_v19 }
 0x1c2   : > { %2679 = verf.f32 %v486_v47  ;;  %v1930_v49 = vrot.slane %v1929_v14, 2  ;;  %v484_v51 = vmul.f32 0.70710677, %v3127_v46  ;;  %v1997_v53 = vsel %vm1891_vm0, %v1490_v45, -inf }
 0x1c3   : > { %v1993_v12 = vrot.slane %v1992_v1, 2  ;;  %v1988_v52 = vrot.slane %v1987_v48, 1  ;;  %v1039_v43 = vrot.slane %v1025_v23, %v3028_v54  ;;  %v519_v55 = vmul.f32 %v507_v31, %v471_v25 }
 0x1c4   : > { %v1947_v16 = vmax.f32 %v1945_v35, %v1946_v2  ;;  %v2495_v58 = vpack.c.bf16 %v1940_v60, %v1940_v60  ;;  %v1040_v4 = vcombine.high %v1032_v5, %v1032_v5  ;;  %v3333_v10 = vrot.slane %v1032_v5, %v3028_v54 }
 0x1c5   : > { %v1994_v62 = vmax.f32 %v1992_v1, %v1993_v12  ;;  %v1989_v42 = vmax.f32 %v1987_v48, %v1988_v52  ;;  %v474_v19 = vmul.f32 0.5, %v3120_v37  ;;  %v1931_v6 = vmax.f32 %v1929_v14, %v1930_v49 }
 0x1c6   : > { %v1998_v40 = vrot.slane %v1997_v53, 4  ;;  %v3337_v9 = vmul.f32 0.5, %v3127_v46  ;;  %v1041_v13 = vcombine.high %v1039_v43, %v1039_v43  ;;  %v927_v15 = vcombine.high %v519_v55, %v519_v55 }
 0x1c7   : > { %v1995_v63 = vrot.slane %v1994_v62, 1  ;;  %v2502_v7 = vpack.c.bf16 %v1989_v42, %v1989_v42  ;;  %2681 = verf.f32 %v484_v51  ;;  %v2496_v30 = vpack.c.bf16 %v1947_v16, %v1947_v16 }
 0x1c8   : > { %v3339_v18 = vunpack.c.l.b16 %v2495_v58  ;;  %v1062_v24 = vrot.slane %v1040_v4, %v3028_v54  ;;  %v1070_v37 = vcombine.high %v3333_v10, %v3333_v10  ;;  %v934_v57 = vrot.slane %v519_v55, %v3028_v54 }
 0x1c9   : > { %v1996_v20 = vmax.f32 %v1994_v62, %v1995_v63  ;;  %v2257_v39 = vunpack.c.l.b16 %v2502_v7  ;;  %v941_v0 = vrot.slane %v927_v15, %v3028_v54  ;;  %v1932_v46 = vrot.slane %v1931_v6, 1 }
 0x1ca   : > { %v1999_v8 = vmax.f32 %v1997_v53, %v1998_v40  ;;  %v926_v27 = vcombine.high %v3204_v3, %v3204_v3  ;;  %v3351_v36 = vrot.slane %v1041_v13, %v3028_v54  ;;  %v942_v33 = vcombine.high %v934_v57, %v934_v57 }
 0x1cb   : > { %v2503_v26 = vpack.c.bf16 %v1996_v20, %v1996_v20  ;;  %v2294_v32 = vsel %vm2284_vm5, %v2257_v39, %v3282_v34  ;;  %v943_v35 = vcombine.high %v941_v0, %v941_v0  ;;  %v1055_v38 = vrot.slane %v1039_v43, %v3028_v54 }
 0x1cc   : > { %v2680_v28 = vpop.eup %2679  ;;  %v1072_v41 = vcombine.high %v1062_v24, %v1062_v24  ;;  %v950_v56 = vrot.slane %v934_v57, %v3028_v54  ;;  %v1744_v17 = vcombine.low %v1062_v24, %v1070_v37  ;;  %v957_v21 = vrot.slane %v941_v0, %v3028_v54 }
 0x1cd   : > { %v2258_v61 = vunpack.c.l.b16 %v2503_v26  ;;  %v964_v3 = vrot.slane %v942_v33, %v3028_v54  ;;  %v971_v47 = vrot.slane %v943_v35, %v3028_v54  ;;  %v3358_v60 = vmax.f32 %v1931_v6, %v1932_v46 }
 0x1ce   : > { %v1606_v14 = vcombine.low %v926_v27, %v950_v56  ;;  %v510_v29 = vadd.f32 1.0, %v2680_v28  ;;  %v2000_v44 = vrot.slane %v1999_v8, 2  ;;  %v1767_v11 = vcombine.low %v1055_v38, %v3351_v36 }
 0x1cf   : > { %v3361_v34 = vsel %vm2286_vm6, %v2258_v61, %v2294_v32  ;;  %v973_v45 = vcombine.high %v957_v21, %v957_v21  ;;  %v975_v50 = vcombine.high %v971_v47, %v971_v47  ;;  %v1071_v23 = vcombine.high %v1055_v38, %v1055_v38 }
 0x1d0   : > { %v1613_v2 = vrot.slane %v1606_v14, %v3028_v54  ;;  %v1620_v1 = vrot.slane %v964_v3, %v3028_v54  ;;  %v2449_v5 = vcombine.high %v950_v56, %v964_v3  ;;  %v1751_v25 = vrot.slane %v1744_v17, %v3028_v54 }
 0x1d1   : > { %v2682_v48 = vpop.eup %2681  ;;  %v1758_v31 = vrot.slane %v1072_v41, %v3028_v54  ;;  %v1652_v49 = vcombine.low %v971_v47, %v973_v45  ;;  %v1666_v12 = vrot.slane %v975_v50, %v3028_v54  ;;  %v1643_v53 = vrot.slane %v957_v21, %v3028_v54 }
 0x1d2   : > { %v1621_v51 = vcombine.low %v1613_v2, %v1620_v1  ;;  %v1636_v52 = vrot.slane %v2449_v5, %v3028_v54  ;;  %v522_v43 = vmul.f32 %v510_v29, %v474_v19  ;;  %v3371_v55 = vunpack.c.l.b16 %v2496_v30 }
 0x1d3   : > { %v2494_v16 = vpack.c.bf16 %v3358_v60, %v3358_v60  ;;  %v1774_v58 = vrot.slane %v1767_v11, %v3028_v54  ;;  %v1659_v62 = vrot.slane %v1652_v49, %v3028_v54  ;;  %v3379_v40 = vmax.f32 %v1999_v8, %v2000_v44 }
 0x1d4   : > { %v1628_v4 = vrot.slane %v1621_v51, %v3028_v54  ;;  %v1644_v42 = vcombine.low %v1636_v52, %v1643_v53  ;;  %v1074_v6 = vcombine.high %v522_v43, %v522_v43  ;;  %v1081_v63 = vrot.slane %v522_v43, %v3028_v54 }
 0x1d5   : > { %v1759_v7 = vcombine.low %v1751_v25, %v1758_v31  ;;  %v1781_v19 = vrot.slane %v1071_v23, %v3028_v54  ;;  %v1667_v13 = vcombine.low %v1659_v62, %v1666_v12  ;;  %v1073_v0 = vcombine.high %v3351_v36, %v3351_v36 }
 0x1d6   : > { %v1651_v15 = vrot.slane %v1644_v42, %v3028_v54  ;;  %v2039_v30 = vsel %vm1891_vm0, %v1628_v4, -inf  ;;  %v1088_v20 = vrot.slane %v1074_v6, %v3028_v54  ;;  %v1089_v24 = vcombine.high %v1081_v63, %v1081_v63 }
 0x1d7   : > { %v1782_v39 = vcombine.low %v1774_v58, %v1781_v19  ;;  %v1674_v37 = vrot.slane %v1667_v13, %v3028_v54  ;;  %v2040_v57 = vrot.slane %v2039_v30, 4  ;;  %v508_v27 = vadd.f32 1.0, %v2682_v48 }
 0x1d8   : > { %v2046_v46 = vsel %vm1891_vm0, %v1651_v15, -inf  ;;  %v1090_v8 = vcombine.high %v1088_v20, %v1088_v20  ;;  %v1104_v26 = vrot.slane %v1088_v20, %v3028_v54  ;;  %v2002_v28 = vrot.slane %v3379_v40, 1 }
 0x1d9   : > { %v1766_v32 = vrot.slane %v1759_v7, %v3028_v54  ;;  %v2041_v33 = vmax.f32 %v2039_v30, %v2040_v57  ;;  %v2047_v35 = vrot.slane %v2046_v46, 4  ;;  %v2053_v61 = vsel %vm1891_vm0, %v1674_v37, -inf }
 0x1da   : > { %v1097_v38 = vrot.slane %v1081_v63, %v3028_v54  ;;  %v1111_v41 = vrot.slane %v1089_v24, %v3028_v54  ;;  %v1118_v36 = vrot.slane %v1090_v8, %v3028_v54  ;;  %v1789_v56 = vrot.slane %v1782_v39, %v3028_v54 }
 0x1db   : > { %v2042_v17 = vrot.slane %v2041_v33, 2  ;;  %v2048_v21 = vmax.f32 %v2046_v46, %v2047_v35  ;;  %v1120_v3 = vcombine.high %v1104_v26, %v1104_v26  ;;  %v2054_v47 = vrot.slane %v2053_v61, 4 }
 0x1dc   : > { %v1122_v14 = vcombine.high %v1118_v36, %v1118_v36  ;;  %v1790_v29 = vcombine.low %v1073_v0, %v1097_v38  ;;  %v520_v44 = vmul.f32 %v508_v27, %v3337_v9  ;;  %v2081_v11 = vsel %vm1891_vm0, %v1766_v32, -inf }
 0x1dd   : > { %v2043_v45 = vmax.f32 %v2041_v33, %v2042_v17  ;;  %v2049_v50 = vrot.slane %v2048_v21, 2  ;;  %v1804_v23 = vrot.slane %v1111_v41, %v3028_v54  ;;  %v2055_v2 = vmax.f32 %v2053_v61, %v2054_v47 }
 0x1de   : > { %v1797_v1 = vrot.slane %v1790_v29, %v3028_v54  ;;  %v2451_v5 = vcombine.high %v1097_v38, %v1111_v41  ;;  %v1827_v48 = vrot.slane %v1104_v26, %v3028_v54  ;;  %v1836_v49 = vcombine.low %v1118_v36, %v1120_v3 }
 0x1df   : > { %v2044_v25 = vrot.slane %v2043_v45, 1  ;;  %v2050_v31 = vmax.f32 %v2048_v21, %v2049_v50  ;;  %v1850_v12 = vrot.slane %v1122_v14, %v3028_v54  ;;  %v2056_v51 = vrot.slane %v2055_v2, 2 }
 0x1e0   : > { %v1805_v52 = vcombine.low %v1797_v1, %v1804_v23  ;;  %v1820_v9 = vrot.slane %v2451_v5, %v3028_v54  ;;  %v976_v53 = vcombine.high %v520_v44, %v520_v44  ;;  %v1843_v62 = vrot.slane %v1836_v49, %v3028_v54 }
 0x1e1   : > { %v2045_v43 = vmax.f32 %v2043_v45, %v2044_v25  ;;  %v2051_v58 = vrot.slane %v2050_v31, 1  ;;  %v983_v4 = vrot.slane %v520_v44, %v3028_v54  ;;  %v2088_v42 = vsel %vm1891_vm0, %v1789_v56, -inf }
 0x1e2   : > { %v2057_v6 = vmax.f32 %v2055_v2, %v2056_v51  ;;  %v1828_v63 = vcombine.low %v1820_v9, %v1827_v48  ;;  %v990_v7 = vrot.slane %v976_v53, %v3028_v54  ;;  %v1812_v15 = vrot.slane %v1805_v52, %v3028_v54 }
 0x1e3   : > { %v2052_v19 = vmax.f32 %v2050_v31, %v2051_v58  ;;  %v2510_v13 = vpack.c.bf16 %v2045_v43, %v2045_v43  ;;  %v1851_v30 = vcombine.low %v1843_v62, %v1850_v12  ;;  %v991_v39 = vcombine.high %v983_v4, %v983_v4 }
 0x1e4   : > { %v2058_v20 = vrot.slane %v2057_v6, 1  ;;  %v1835_v24 = vrot.slane %v1828_v63, %v3028_v54  ;;  %v992_v37 = vcombine.high %v990_v7, %v990_v7  ;;  %v2249_v57 = vunpack.c.l.b16 %v2494_v16 }
 0x1e5   : > { %v2003_v0 = vmax.f32 %v3379_v40, %v2002_v28  ;;  %v2511_v46 = vpack.c.bf16 %v2052_v19, %v2052_v19  ;;  %v2265_v8 = vunpack.c.l.b16 %v2510_v13  ;;  %v1735_v26 = vrot.slane %v3333_v10, %v3028_v54 }
 0x1e6   : > { %v2059_v27 = vmax.f32 %v2057_v6, %v2058_v20  ;;  %v1858_v32 = vrot.slane %v1851_v30, %v3028_v54  ;;  %v999_v33 = vrot.slane %v983_v4, %v3028_v54  ;;  %v2082_v35 = vrot.slane %v2081_v11, 4 }
 0x1e7   : > { %v2089_v61 = vrot.slane %v2088_v42, 4  ;;  %v2266_v38 = vunpack.c.l.b16 %v2511_v46  ;;  %v2301_v41 = vsel %vm2284_vm5, %v2265_v8, %v3277_v22  ;;  %v2095_v60 = vsel %vm1891_vm0, %v1812_v15, -inf }
 0x1e8   : > { %v2102_v16 = vsel %vm1891_vm0, %v1835_v24, -inf  ;;  %v1013_v40 = vrot.slane %v991_v39, %v3028_v54  ;;  %v1020_v28 = vrot.slane %v992_v37, %v3028_v54  ;;  %v2504_v10 = vpack.c.bf16 %v2003_v0, %v2003_v0 }
 0x1e9   : > { %v2512_v36 = vpack.c.bf16 %v2059_v27, %v2059_v27  ;;  %v2302_v56 = vsel %vm2286_vm6, %v2266_v38, %v2301_v41  ;;  %v1006_v17 = vrot.slane %v990_v7, %v3028_v54  ;;  %v2109_v21 = vsel %vm1891_vm0, %v1858_v32, -inf }
 0x1ea   : > { %v1021_v3 = vcombine.high %v999_v33, %v999_v33  ;;  %v1023_v47 = vcombine.high %v1013_v40, %v1013_v40  ;;  %v1675_v14 = vcombine.low %v999_v33, %v1013_v40  ;;  %v2083_v22 = vmax.f32 %v2081_v11, %v2082_v35 }
 0x1eb   : > { %v2090_v29 = vmax.f32 %v2088_v42, %v2089_v61  ;;  %v2096_v44 = vrot.slane %v2095_v60, 4  ;;  %v2103_v45 = vrot.slane %v2102_v16, 4  ;;  %v2450_v1 = vcombine.high %v1006_v17, %v1020_v28 }
 0x1ec   : > { %v1682_v50 = vrot.slane %v1675_v14, %v3028_v54  ;;  %v1689_v23 = vrot.slane %v1021_v3, %v3028_v54  ;;  %v1698_v2 = vcombine.low %v1023_v47, %v1006_v17  ;;  %v2267_v5 = vunpack.c.l.b16 %v2512_v36 }
 0x1ed   : > { %v2110_v48 = vrot.slane %v2109_v21, 4  ;;  %v1712_v25 = vrot.slane %v1020_v28, %v3028_v54  ;;  %v2285_v31 = vsel %vm2284_vm5, %v2249_v57, %v3324_v59  ;;  %v1728_v12 = vrot.slane %v2450_v1, %v3028_v54 }
 0x1ee   : > { %v1690_v49 = vcombine.low %v1682_v50, %v1689_v23  ;;  %v1705_v11 = vrot.slane %v1698_v2, %v3028_v54  ;;  %v2287_v51 = vsel %vm2286_vm6, %v3339_v18, %v2285_v31  ;;  %v2259_v52 = vunpack.c.l.b16 %v2504_v10 }
 0x1ef   : > { %v2097_v9 = vmax.f32 %v2095_v60, %v2096_v44  ;;  %v2104_v53 = vmax.f32 %v2102_v16, %v2103_v45  ;;  %v1736_v62 = vcombine.low %v1728_v12, %v1735_v26  ;;  %v2289_v59 = vsel %vm2288_vm7, %v3371_v55, %v2287_v51 }
 0x1f0   : > { %v1697_v43 = vrot.slane %v1690_v49, %v3028_v54  ;;  %v1713_v58 = vcombine.low %v1705_v11, %v1712_v25  ;;  %v2084_v4 = vrot.slane %v2083_v22, 2  ;;  %v2091_v42 = vrot.slane %v2090_v29, 2 }
 0x1f1   : > { %v2111_v6 = vmax.f32 %v2109_v21, %v2110_v48  ;;  %v2296_v63 = vsel %vm2288_vm7, %v2259_v52, %v3361_v34  ;;  %v1743_v7 = vrot.slane %v1736_v62, %v3028_v54  ;;  %v2303_v13 = vsel %vm2288_vm7, %v2267_v5, %v2302_v56 }
 0x1f2   : > { %v1720_v18 = vrot.slane %v1713_v58, %v3028_v54  ;;  %v2060_v19 = vsel %vm1891_vm0, %v1697_v43, -inf  ;;  %v2098_v15 = vrot.slane %v2097_v9, 2  ;;  %v2105_v30 = vrot.slane %v2104_v53, 2 }
 0x1f3   : > { %v2061_v20 = vrot.slane %v2060_v19, 4  ;;  %v2074_v55 = vsel %vm1891_vm0, %v1743_v7, -inf  ;;  %v2311_v39 = vpack.c.b16 %v2289_v59, %v2289_v59  ;;  %v2312_v37 = vpack.c.b16 %v2296_v63, %v2296_v63 }
 0x1f4   : > { %v2067_v24 = vsel %vm1891_vm0, %v1720_v18, -inf  ;;  %v2085_v57 = vmax.f32 %v2083_v22, %v2084_v4  ;;  %v2112_v0 = vrot.slane %v2111_v6, 2  ;;  %v2092_v8 = vmax.f32 %v2090_v29, %v2091_v42 }
 0x1f5   : > { %v2062_v34 = vmax.f32 %v2060_v19, %v2061_v20  ;;  %v2068_v46 = vrot.slane %v2067_v24, 4  ;;  %v2075_v26 = vrot.slane %v2074_v55, 4  ;;  %v2313_v54 = vpack.c.b16 %v2303_v13, %v2303_v13  ;;  %2319 = vst [vmem:[%s3448_s28] sm:$0xf] %v2311_v39  ;;  %2320 = vst [vmem:[%s3448_s28 + $0x4] sm:$0xf] %v2312_v37 }
 0x1f6   : > { %v2099_v27 = vmax.f32 %v2097_v9, %v2098_v15  ;;  %v2106_v35 = vmax.f32 %v2104_v53, %v2105_v30  ;;  %v2086_v38 = vrot.slane %v2085_v57, 1  ;;  %v2113_v41 = vmax.f32 %v2111_v6, %v2112_v0 }
 0x1f7   : > { %v2063_v32 = vrot.slane %v2062_v34, 2  ;;  %v2069_v33 = vmax.f32 %v2067_v24, %v2068_v46  ;;  %v2076_v61 = vmax.f32 %v2074_v55, %v2075_v26  ;;  %2321 = vst [vmem:[%s3448_s28 + $0x8] sm:$0xf] %v2313_v54  ;;  %v2093_v40 = vrot.slane %v2092_v8, 1 }
 0x1f8   : > { %v2100_v10 = vrot.slane %v2099_v27, 1  ;;  %v2107_v17 = vrot.slane %v2106_v35, 1  ;;  %v2087_v3 = vmax.f32 %v2085_v57, %v2086_v38  ;;  %v2114_v47 = vrot.slane %v2113_v41, 1 }
 0x1f9   : > { %v2064_v60 = vmax.f32 %v2062_v34, %v2063_v32  ;;  %v2070_v16 = vrot.slane %v2069_v33, 2  ;;  %v2077_v28 = vrot.slane %v2076_v61, 2  ;;  %v2094_v29 = vmax.f32 %v2092_v8, %v2093_v40 }
 0x1fa   : > { %v2101_v45 = vmax.f32 %v2099_v27, %v2100_v10  ;;  %v2108_v2 = vmax.f32 %v2106_v35, %v2107_v17  ;;  %v2516_v5 = vpack.c.bf16 %v2087_v3, %v2087_v3  ;;  %v2115_v48 = vmax.f32 %v2113_v41, %v2114_v47 }
 0x1fb   : > { %v2065_v36 = vrot.slane %v2064_v60, 1  ;;  %v2071_v56 = vmax.f32 %v2069_v33, %v2070_v16  ;;  %v2078_v21 = vmax.f32 %v2076_v61, %v2077_v28  ;;  %v2517_v31 = vpack.c.bf16 %v2094_v29, %v2094_v29 }
 0x1fc   : > { %v2518_v11 = vpack.c.bf16 %v2101_v45, %v2101_v45  ;;  %v2519_v52 = vpack.c.bf16 %v2108_v2, %v2108_v2  ;;  %v2271_v53 = vunpack.c.l.b16 %v2516_v5  ;;  %v2520_v43 = vpack.c.bf16 %v2115_v48, %v2115_v48 }
 0x1fd   : > { %v2066_v14 = vmax.f32 %v2064_v60, %v2065_v36  ;;  %v2072_v22 = vrot.slane %v2071_v56, 1  ;;  %v2079_v44 = vrot.slane %v2078_v21, 1  ;;  %v2272_v62 = vunpack.c.l.b16 %v2517_v31 }
 0x1fe   : > { %v2273_v4 = vunpack.c.l.b16 %v2518_v11  ;;  %v2274_v6 = vunpack.c.l.b16 %v2519_v52  ;;  %v2275_v18 = vunpack.c.l.b16 %v2520_v43 }
 0x1ff   : > { %v2073_v50 = vmax.f32 %v2071_v56, %v2072_v22  ;;  %v2513_v23 = vpack.c.bf16 %v2066_v14, %v2066_v14  ;;  %v2080_v1 = vmax.f32 %v2078_v21, %v2079_v44 }
 0x201   : > { %v2514_v25 = vpack.c.bf16 %v2073_v50, %v2073_v50  ;;  %v2515_v49 = vpack.c.bf16 %v2080_v1, %v2080_v1  ;;  %v2268_v12 = vunpack.c.l.b16 %v2513_v23 }
 0x203   : > { %v2269_v51 = vunpack.c.l.b16 %v2514_v25  ;;  %v2270_v9 = vunpack.c.l.b16 %v2515_v49 }
 0x205   : > { %v2304_v58 = vsel %vm2276_vm1, %v2269_v51, %v2268_v12 }
 0x206   : > { %v2305_v59 = vsel %vm2278_vm2, %v2270_v9, %v2304_v58 }
 0x207   : > { %v2306_v42 = vsel %vm2280_vm3, %v2271_v53, %v2305_v59 }
 0x208   : > { %v2307_v63 = vsel %vm2282_vm4, %v2272_v62, %v2306_v42 }
 0x209   : > { %v2308_v7 = vsel %vm2284_vm5, %v2273_v4, %v2307_v63 }
 0x20a   : > { %v2309_v19 = vsel %vm2286_vm6, %v2274_v6, %v2308_v7 }
 0x20b   : > { %v2310_v13 = vsel %vm2288_vm7, %v2275_v18, %v2309_v19 }
 0x20c   : > { %v2314_v15 = vpack.c.b16 %v2310_v13, %v2310_v13 }
 0x20e   : > { %2322 = vst [vmem:[%s3448_s28 + $0xc] sm:$0xf] %v2314_v15 }
 0x20f   : > { %2754 = shalt.err (!%p2751_p7)
}
 0x210   : > { %s2755_s25 = scalar_lea.hbm %s3465_s6, 256  ;;  %s2759_s12 = scalar_lea.hbm %s3515_s4, 1024 }
 0x211   : > { %p2756_p9 = scmp.ne.s32.totalorder %s3465_s6, %s2755_s25  ;;  %p2760_p5 = scmp.lt.u32.totalorder %s3465_s6, %s3515_s4 }
 0x212   : > { %p2761_p13 = scmp.lt.u32.totalorder %s2759_s12, %s2755_s25  ;;  %p2763_p4 = scmp.lt.u32.totalorder %s2755_s25, %s3465_s6 }
 0x213   : > { %p2757_p1 = pnand %p2756_p9, %p2932_p12 }
 0x214   : > { %p2762_p2 = por %p2761_p13, %p2760_p5 }
 0x215   : > { %p2758_p0 = pneg %p2757_p1 }
 0x216   : > { %p2764_p6 = por %p2763_p4, %p2762_p2 }
 0x218   : > { %p2765_p8 = pnand %p2764_p6, %p2758_p0 }
 0x21a   : > { %2768 = shalt.err (!%p2765_p8)
}
 0x21b   : > { %s2819_s28 = smov 64   ;;  %s2820_s9 = smov 4  }
 0x21c   : > { %2589 = dma.vmem_to_hbm [thread:$0]  (%p2932_p12), %s3467_s10, 256, %s3465_s6, %s2324_s19, %s2819_s28, %s2819_s28, %s2820_s9  }
 0x21d PF: > { %p2606_p11 = scmp.ge.s32.totalorder %s2811_s18, 2  ;;  %s2352_s29 = sand.u32 1, %s2799_s15  }
 0x21e   : > { %p3530_p10 = scmp.ne.s32.totalorder %s3520_s22, 0  ;;  %s2353_s26 = scalar_lea.sflag [#allocation4], %s2352_s29 }
 0x220   : > { %p2600_p3 = pnand %p2606_p11, %p3530_p10 }
 0x222   : > { %2794 = dma.done.wait (!%p2600_p3), %s2353_s26, 256  }
 0x223   : > { %2796 = vsyncadd (!%p2600_p3), %s2353_s26, 4294967040  ;;  %p18_p7 = scmp.ge.s32.totalorder %s2899_s27, 6   ;;  %s3531_s15 = smov %s2803_s16 }
 0x224   : > { %s3532_s16 = smov %s2807_s17  ;;  %s3533_s17 = smov %s2928_s24 }
 0x225   : > { %s3534_s18 = smov %s2899_s27  ;;  %20 = sbr.rel (!%p18_p7) target bundleno = 6 (0x6), region = 85 }
 0x22c   :  { %2358 = vsyncpa [#allocation3], 1 }
 0x22d   :  { %2360 = vsyncpa [#allocation3 + $0x1], 1 }
 0x22e   :  { %2361 = vsyncpa [#allocation6], 1 }
 0x22f   :  { %2362 = vsyncpa [#allocation4], 1 }
 0x230   :  { %2364 = vsyncpa [#allocation4 + $0x1], 1 }

</bundles_post_ra>
